<compile_context>
chip_gen: v7x
topology: tpu7x:2x2x1
jax: 0.10.0
libtpu: 0.0.40
codegen_flags: <defaults>
</compile_context>

<pallas_src>
import functools

import jax
import jax.numpy as jnp
from jax.experimental import pallas as pl
from jax.experimental.pallas import tpu as pltpu

FEAT_DIM = 2048                    # descriptor size implied by .view(1, 2048)
LANE = 128                         # TPU lane width
TILE_HW_BYTES = 4 * 1024 * 1024    # per-buffer budget for the streamed x tile


def _descriptor_kernel(x_ref, wt_ref, b_ref, o_ref, pool_ref, *, inv_hw):
    """Grid axis 0 streams lane-dense HW tiles of the (C, HW) activation slab.

    x_ref:    (C, TILE_HW)        activation tile, HW lane-dense
    wt_ref:   (FEAT_DIM, C) bf16  projection weight (pre-transposed), resident
    b_ref:    (FEAT_DIM, 1) f32   bias column, resident
    o_ref:    (FEAT_DIM, 1) f32   descriptor column (written on last step only)
    pool_ref: (C, 1) f32          running spatial sum
    """
    k = pl.program_id(0)

    @pl.when(k == 0)
    def _init():
        pool_ref[...] = jnp.zeros_like(pool_ref)

    # Lane reduction over the spatial axis; accumulate in f32 so bf16 or f32
    # inputs (and v5e, which has no bf16 VALU) all take the same path.
    pool_ref[...] += jnp.sum(x_ref[...].astype(jnp.float32), axis=-1,
                             keepdims=True)

    @pl.when(k == pl.num_programs(0) - 1)
    def _finalize():
        pooled = (pool_ref[...] * inv_hw).astype(wt_ref.dtype)    # (C, 1) mean
        acc = jnp.dot(wt_ref[...], pooled,
                      preferred_element_type=jnp.float32)         # (FEAT_DIM,1)
        o_ref[...] = (acc + b_ref[...]).astype(o_ref.dtype)


def pallas_descriptor(x_slab, weight_t, bias_col, hw_true,
                      tile_hw_bytes=TILE_HW_BYTES):
    """x_slab: (C, HW); weight_t: (FEAT_DIM, C) bf16; bias_col: (FEAT_DIM, 1)."""
    c, hw = x_slab.shape
    assert weight_t.shape == (FEAT_DIM, c)
    assert bias_col.shape == (FEAT_DIM, 1)

    elem_bytes = jnp.dtype(x_slab.dtype).itemsize
    # Budget-driven, lane-dense (multiple-of-128) spatial tile; collapses to a
    # single grid step whenever the whole slab fits the budget.
    hw_full = ((hw + LANE - 1) // LANE) * LANE
    cap = max(LANE, (tile_hw_bytes // (elem_bytes * c)) // LANE * LANE)
    tile_hw = min(cap, hw_full)
    n_tiles = pl.cdiv(hw, tile_hw)
    hw_pad = n_tiles * tile_hw
    if hw_pad != hw:
        # Zero-pad the lane axis only: padded columns add 0 to the pooled sum
        # and the mean divides by the true HW.
        x_slab = jnp.pad(x_slab, ((0, 0), (0, hw_pad - hw)))

    # TODO(synk): hw baked in at trace time -> one compile per image size; pass
    # it as an SMEM scalar if image sizes vary at runtime.
    kernel = functools.partial(_descriptor_kernel, inv_hw=1.0 / float(hw_true))

    out_col = pl.pallas_call(
        kernel,
        out_shape=jax.ShapeDtypeStruct((FEAT_DIM, 1), jnp.float32),
        grid_spec=pltpu.PrefetchScalarGridSpec(
            num_scalar_prefetch=0,
            grid=(n_tiles,),                                   # HW reduction axis
            in_specs=[
                pl.BlockSpec((c, tile_hw), lambda k: (0, k)),      # spatial tile
                pl.BlockSpec((FEAT_DIM, c), lambda k: (0, 0)),     # full weight
                pl.BlockSpec((FEAT_DIM, 1), lambda k: (0, 0)),     # full bias
            ],
            out_specs=pl.BlockSpec((FEAT_DIM, 1), lambda k: (0, 0)),
            scratch_shapes=[pltpu.VMEM((c, 1), jnp.float32)],      # pooled sum
        ),
        compiler_params=pltpu.CompilerParams(
            dimension_semantics=("arbitrary",),                # reduction axis
            vmem_limit_bytes=48 * 1024 * 1024,                 # v7x-safe (<64MiB)
        ),
    )(x_slab, weight_t, bias_col)
    return out_col


class NetworkPallas:
    """Pallas equivalent of Network: forward(x) -> model(x).view(1, 2048)."""

    def __init__(self, in_channels, key=jax.random.PRNGKey(0)):
        kw, kb = jax.random.split(key)
        # TODO(synk): the real backbone is an arbitrary external CNN producing
        # a 2048-d descriptor; replaced by a deterministic GAP + linear head so
        # the whole forward is one fused Pallas kernel.
        w = (jax.random.normal(kw, (in_channels, FEAT_DIM), dtype=jnp.float32)
             / jnp.sqrt(jnp.float32(in_channels)))
        # Stored pre-transposed (out, in) and in bf16: canonical matmul form in
        # the kernel and half the weight HBM stream.
        self.weight_t = jnp.transpose(w).astype(jnp.bfloat16)    # (2048, C)
        self.bias = 0.01 * jax.random.normal(kb, (FEAT_DIM,), dtype=jnp.float32)
        self.bias_col = self.bias.reshape(FEAT_DIM, 1)
        # Buffers from the PyTorch __init__ (unused in forward), kept for parity.
        self.mean = jnp.array([0.485, 0.456, 0.406],
                              dtype=jnp.float32).reshape(3, 1, 1)
        self.std = jnp.array([0.229, 0.224, 0.225],
                             dtype=jnp.float32).reshape(3, 1, 1)

    def forward(self, x, tile_hw_bytes=TILE_HW_BYTES):
        # x: (1, C, H, W) NCHW, matching the PyTorch call convention.
        n, c, h, w = x.shape
        assert n == 1, ".view(1, 2048) in the reference implies batch size 1"
        # Zero-copy for batch-1 NCHW: (1, C, H, W) -> (C, H*W); HW becomes the
        # lane-dense streamed axis (no wrapper transpose, no extra HBM copy).
        x_slab = x.reshape(c, h * w)
        out_col = pallas_descriptor(x_slab, self.weight_t, self.bias_col,
                                    h * w, tile_hw_bytes)
        return out_col.reshape(1, FEAT_DIM)                 # .view(1, 2048)

    __call__ = forward


if __name__ == "__main__":
    key = jax.random.PRNGKey(0)
    k_in, k_param = jax.random.split(key)

    # Small deterministic NCHW input (batch 1 as the reference implies).
    N, C, H, W = 1, 8, 32, 32
    x = jax.random.normal(k_in, (N, C, H, W), dtype=jnp.float32)

    net = NetworkPallas(in_channels=C, key=k_param)
    # Use a small per-tile byte budget here so the demo exercises the
    # multi-step spatial reduction (4 tiles of 256 lanes); the production
    # default is 4 MiB tiles (single step for this shape).
    out = net(x, tile_hw_bytes=8 * 1024)
    out = jax.block_until_ready(out)

    # Pure-JAX reference of the same synthetic head (same dtypes as kernel).
    pooled_ref = jnp.mean(x.reshape(C, H * W).astype(jnp.float32),
                          axis=-1, keepdims=True)                 # (C, 1) f32
    ref_col = (jnp.dot(net.weight_t, pooled_ref.astype(jnp.bfloat16),
                       preferred_element_type=jnp.float32)
               + net.bias_col)
    ref = ref_col.reshape(1, FEAT_DIM)

    assert out.shape == (1, FEAT_DIM), out.shape
    assert jnp.allclose(out, ref, atol=2e-3, rtol=2e-2), float(
        jnp.max(jnp.abs(out - ref)))

    print("KERNEL_OK")
</pallas_src>

<mosaic_0001>
module attributes {stable_mosaic.version = 11 : i64} {
  func.func @_descriptor_kernel(%arg0: i32, %arg1: memref<8x256xf32, #tpu.memory_space<vmem>>, %arg2: memref<2048x8xbf16, #tpu.memory_space<vmem>>, %arg3: memref<2048x1xf32, #tpu.memory_space<vmem>>, %arg4: memref<2048x1xf32, #tpu.memory_space<vmem>>, %arg5: memref<8x1xf32, #tpu.memory_space<vmem>>) attributes {dimension_semantics = [#tpu.dimension_semantics<arbitrary>], iteration_bounds = array<i64: 4>, scalar_prefetch = 0 : i64, scratch_operands = 1 : i64, tpu.core_type = #tpu.core_type<tc>, window_params = [{transform_indices = @transform_0, window_bounds = array<i64: 8, 256>}, {pipeline_mode = #tpu.pipeline_mode<synchronous>, transform_indices = @transform_1, window_bounds = array<i64: 2048, 8>}, {pipeline_mode = #tpu.pipeline_mode<synchronous>, transform_indices = @transform_2, window_bounds = array<i64: 2048, 1>}, {pipeline_mode = #tpu.pipeline_mode<synchronous>, transform_indices = @transform_3, window_bounds = array<i64: 2048, 1>}]} {
    %c0_i32 = arith.constant 0 : i32
    %0 = arith.cmpi eq, %arg0, %c0_i32 : i32
    %1 = arith.extui %0 : i1 to i32
    %c0_i32_0 = arith.constant 0 : i32
    %2 = arith.cmpi ne, %1, %c0_i32_0 : i32
    scf.if %2 {
      %cst_7 = arith.constant 0.000000e+00 : f32
      %12 = vector.broadcast %cst_7 : f32 to vector<8x1xf32>
      %c0_8 = arith.constant 0 : index
      %c0_9 = arith.constant 0 : index
      %13 = vector.load %arg5[%c0_8, %c0_9] : memref<8x1xf32, #tpu.memory_space<vmem>>, vector<8x1xf32>
      tpu.vector_store %arg5[%c0_8, %c0_9], %12 {strides = array<i32>} : memref<8x1xf32, #tpu.memory_space<vmem>>, vector<8x1xf32>,
    } else {
    }
    %c0 = arith.constant 0 : index
    %c0_1 = arith.constant 0 : index
    %3 = vector.load %arg5[%c0, %c0_1] : memref<8x1xf32, #tpu.memory_space<vmem>>, vector<8x1xf32>
    %c0_2 = arith.constant 0 : index
    %c0_3 = arith.constant 0 : index
    %4 = vector.load %arg1[%c0_2, %c0_3] : memref<8x256xf32, #tpu.memory_space<vmem>>, vector<8x256xf32>
    %cst = arith.constant dense<0.000000e+00> : vector<8xf32>
    %5 = vector.multi_reduction <add>, %4, %cst [1] : vector<8x256xf32> to vector<8xf32>
    %6 = vector.shape_cast %5 : vector<8xf32> to vector<8x1xf32>
    %7 = arith.addf %3, %6 : vector<8x1xf32>
    %c0_4 = arith.constant 0 : index
    %c0_5 = arith.constant 0 : index
    %8 = vector.load %arg5[%c0_4, %c0_5] : memref<8x1xf32, #tpu.memory_space<vmem>>, vector<8x1xf32>
    tpu.vector_store %arg5[%c0_4, %c0_5], %7 {strides = array<i32>} : memref<8x1xf32, #tpu.memory_space<vmem>>, vector<8x1xf32>,
    %c3_i32 = arith.constant 3 : i32
    %9 = arith.cmpi eq, %arg0, %c3_i32 : i32
    %10 = arith.extui %9 : i1 to i32
    %c0_i32_6 = arith.constant 0 : i32
    %11 = arith.cmpi ne, %10, %c0_i32_6 : i32
    scf.if %11 {
      %c0_7 = arith.constant 0 : index
      %c0_8 = arith.constant 0 : index
      %12 = vector.load %arg5[%c0_7, %c0_8] : memref<8x1xf32, #tpu.memory_space<vmem>>, vector<8x1xf32>
      %cst_9 = arith.constant 9.765625E-4 : f32
      %13 = vector.broadcast %cst_9 : f32 to vector<8x1xf32>
      %14 = arith.mulf %12, %13 : vector<8x1xf32>
      %15 = arith.truncf %14 : vector<8x1xf32> to vector<8x1xbf16>
      %c0_10 = arith.constant 0 : index
      %c0_11 = arith.constant 0 : index
      %16 = vector.load %arg2[%c0_10, %c0_11] : memref<2048x8xbf16, #tpu.memory_space<vmem>>, vector<2048x8xbf16>
      %cst_12 = arith.constant dense<0.000000e+00> : vector<2048x1xf32>
      %17 = tpu.matmul %16, %15, %cst_12 {dimension_numbers = #tpu.dot_dimension_numbers<[1], [0], [0], [1], [0, 0, 1, 1], [], []>} : vector<2048x8xbf16>, vector<8x1xbf16>, vector<2048x1xf32> -> vector<2048x1xf32>
      %c0_13 = arith.constant 0 : index
      %c0_14 = arith.constant 0 : index
      %18 = vector.load %arg3[%c0_13, %c0_14] : memref<2048x1xf32, #tpu.memory_space<vmem>>, vector<2048x1xf32>
      %19 = arith.addf %17, %18 : vector<2048x1xf32>
      %c0_15 = arith.constant 0 : index
      %c0_16 = arith.constant 0 : index
      %20 = vector.load %arg4[%c0_15, %c0_16] : memref<2048x1xf32, #tpu.memory_space<vmem>>, vector<2048x1xf32>
      tpu.vector_store %arg4[%c0_15, %c0_16], %19 {strides = array<i32>} : memref<2048x1xf32, #tpu.memory_space<vmem>>, vector<2048x1xf32>,
    } else {
    }
    return
  }
  func.func @transform_0(%arg0: i32) -> (i32, i32) {
    %c0_i32 = arith.constant 0 : i32
    %c0_i32_0 = arith.constant 0 : i32
    return %c0_i32, %arg0 : i32, i32
  }
  func.func @transform_1(%arg0: i32) -> (i32, i32) {
    %c0_i32 = arith.constant 0 : i32
    %c0_i32_0 = arith.constant 0 : i32
    %c0_i32_1 = arith.constant 0 : i32
    return %c0_i32, %c0_i32_0 : i32, i32
  }
  func.func @transform_2(%arg0: i32) -> (i32, i32) {
    %c0_i32 = arith.constant 0 : i32
    %c0_i32_0 = arith.constant 0 : i32
    %c0_i32_1 = arith.constant 0 : i32
    return %c0_i32, %c0_i32_0 : i32, i32
  }
  func.func @transform_3(%arg0: i32) -> (i32, i32) {
    %c0_i32 = arith.constant 0 : i32
    %c0_i32_0 = arith.constant 0 : i32
    %c0_i32_1 = arith.constant 0 : i32
    return %c0_i32, %c0_i32_0 : i32, i32
  }
}

</mosaic_0001>

<bundles_post_ra>
// kernel: tpu_custom_call.1
= control target key start
LH: loop header
LB: loop body
LE: loop exit
PB: predicated region body
PF: predicated region fallthrough
CT: control target
= control target key end

     0   :  { %s3886_s12 = smov 0   ;;  %s6205_s0 = inlined_call_operand.vmem [shape: f32[8,1024], index: 0, kind: input, shape index: {}]   ;;  %s6206_s1 = inlined_call_operand.vmem [shape: bf16[2048,8], index: 1, kind: input, shape index: {}]   ;;  %s6207_s2 = inlined_call_operand.vmem [shape: f32[2048,1], index: 2, kind: input, shape index: {}]   ;;  %s6208_s3 = inlined_call_operand.vmem [shape: f32[2048,1], index: 3, kind: output, shape index: {}]  }
   0x1 LB: > { %s3063_s13 = sadd.s32 4294967295, %s3863_s12   ;;  %p3066_p0 = scmp.ge.s32.totalorder %s3863_s12, 1  ;;  %s3863_s12 = sphi %s3886_s12, %s13_s12  }
   0x2   : > { %p133_p1 = scmp.lt.s32.totalorder %s3863_s12, 5 }
   0x4   : > { %p134_p2 = pnand %p3066_p0, %p133_p1 }
   0x5   : > { %s3067_s14 = sshll.u32 (!%p134_p2), %s3063_s13, 1  ;;  %p3069_p4 = scmp.ne.s32.totalorder (!%p134_p2), %s3063_s13, 0 }
   0x6   : > { %137 = sbr.rel (%p134_p2) target bundleno = 649 (0x289), region = 32  ;;  %p153_p3 = scmp.lt.s32.totalorder (!%p134_p2), %s3067_s14, 7 }
   0xd   : > { %s6210_s14 = smov (!%p153_p3, %s3067_s14), 7  ;;  %162 = sbr.rel (%p3069_p4) target bundleno = 20 (0x14), region = 36 }
   0xe   : > { %s3068_s15 = sshll.u32 %s6210_s14, 3  ;;  %vm163_vm0 = vcmask (!%p3069_p4), 7168   ;;  %v3865_v0 = vmov (!%p3069_p4), 0.0  }
   0xf   : > { %s156_s18 = scalar_lea.vmem %s6205_s0, %s3068_s15  ;;  %164 = vst.msk [vmem:[#allocation2] sm:$0xff] (!%p3069_p4), %vm163_vm0, %v3865_v0 }
  0x14 PF: > { %v166_v1 = vld [vmem:[%s156_s18] sm:$0xff]  ;;  %v167_v2 = vld [vmem:[%s156_s18 + $0x8] sm:$0xff]  ;;  %vm172_vm1 = vcmask 7168   ;;  %p3070_p5 = scmp.ne.s32.totalorder %s3063_s13, 3 }
  0x15   : > { %v168_v3 = vadd.f32 %v167_v2, %v166_v1  ;;  %vm1718_vm2 = vcmask (!%p3070_p5), 1043456   ;;  %v3729_v9 = vld [vmem:[%s6206_s1] sm:$0xff] (!%p3070_p5)   ;;  %vm1333_vm3 = vcmask (!%p3070_p5), 64512   ;;  %v3731_v12 = vld [vmem:[%s6206_s1 + $0x8] sm:$0xff] (!%p3070_p5)   ;;  %v3733_v15 = vld [vmem:[%s6206_s1 + $0x10] sm:$0xff] (!%p3070_p5)  }
  0x16   : > { %v165_v4 = vld [vmem:[#allocation2] sm:$0xff]  ;;  %3460 = vmatprep.mubr.msk.bf16.mxu0 (!%p3070_p5), %vm1333_vm3, %v3729_v9  ;;  %v3732_v13 = vld [vmem:[%s6206_s1 + $0x208] sm:$0xff] (!%p3070_p5)   ;;  %v3734_v16 = vld [vmem:[%s6206_s1 + $0x210] sm:$0xff] (!%p3070_p5)  }
  0x17   : > { %169 = vadd.xlane.f32.xlu0 %v168_v3  ;;  %v3730_v10 = vld [vmem:[%s6206_s1 + $0x200] sm:$0xff] (!%p3070_p5)   ;;  %v3735_v17 = vld [vmem:[%s6206_s1 + $0x18] sm:$0xff] (!%p3070_p5)   ;;  %v3739_v21 = vld [vmem:[%s6206_s1 + $0x28] sm:$0xff] (!%p3070_p5)  }
  0x18   : > { %3588 = vmatprep.mubr.msk.bf16.mxu1 (!%p3070_p5), %vm1333_vm3, %v3730_v10  ;;  %v3736_v18 = vld [vmem:[%s6206_s1 + $0x218] sm:$0xff] (!%p3070_p5)   ;;  %v3737_v19 = vld [vmem:[%s6206_s1 + $0x20] sm:$0xff] (!%p3070_p5)   ;;  %v3740_v22 = vld [vmem:[%s6206_s1 + $0x228] sm:$0xff] (!%p3070_p5)  }
  0x19   : > { %v3738_v20 = vld [vmem:[%s6206_s1 + $0x220] sm:$0xff] (!%p3070_p5)   ;;  %v3741_v23 = vld [vmem:[%s6206_s1 + $0x30] sm:$0xff] (!%p3070_p5)   ;;  %v3743_v25 = vld [vmem:[%s6206_s1 + $0x38] sm:$0xff] (!%p3070_p5)  }
  0x1a   : > { %v3742_v24 = vld [vmem:[%s6206_s1 + $0x230] sm:$0xff] (!%p3070_p5)   ;;  %v3744_v26 = vld [vmem:[%s6206_s1 + $0x238] sm:$0xff] (!%p3070_p5)   ;;  %v3745_v27 = vld [vmem:[%s6206_s1 + $0x40] sm:$0xff] (!%p3070_p5)  }
  0x1b   : > { %v3746_v28 = vld [vmem:[%s6206_s1 + $0x240] sm:$0xff] (!%p3070_p5)   ;;  %v3747_v29 = vld [vmem:[%s6206_s1 + $0x48] sm:$0xff] (!%p3070_p5)   ;;  %v3749_v31 = vld [vmem:[%s6206_s1 + $0x50] sm:$0xff] (!%p3070_p5)  }
  0x1c   : > { %v3748_v30 = vld [vmem:[%s6206_s1 + $0x248] sm:$0xff] (!%p3070_p5)   ;;  %v3750_v32 = vld [vmem:[%s6206_s1 + $0x250] sm:$0xff] (!%p3070_p5)   ;;  %v3751_v33 = vld [vmem:[%s6206_s1 + $0x58] sm:$0xff] (!%p3070_p5)  }
  0x1d   : > { %v3752_v34 = vld [vmem:[%s6206_s1 + $0x258] sm:$0xff] (!%p3070_p5)   ;;  %v3753_v35 = vld [vmem:[%s6206_s1 + $0x60] sm:$0xff] (!%p3070_p5)   ;;  %v3755_v37 = vld [vmem:[%s6206_s1 + $0x68] sm:$0xff] (!%p3070_p5)  }
  0x1e   : > { %v3754_v36 = vld [vmem:[%s6206_s1 + $0x260] sm:$0xff] (!%p3070_p5)   ;;  %v3756_v38 = vld [vmem:[%s6206_s1 + $0x268] sm:$0xff] (!%p3070_p5)   ;;  %v3757_v39 = vld [vmem:[%s6206_s1 + $0x70] sm:$0xff] (!%p3070_p5)  }
  0x1f   : > { %v3758_v40 = vld [vmem:[%s6206_s1 + $0x270] sm:$0xff] (!%p3070_p5)   ;;  %v3759_v41 = vld [vmem:[%s6206_s1 + $0x78] sm:$0xff] (!%p3070_p5)   ;;  %v3761_v43 = vld [vmem:[%s6206_s1 + $0x80] sm:$0xff] (!%p3070_p5)  }
  0x20   : > { %v3760_v42 = vld [vmem:[%s6206_s1 + $0x278] sm:$0xff] (!%p3070_p5)   ;;  %v3762_v44 = vld [vmem:[%s6206_s1 + $0x280] sm:$0xff] (!%p3070_p5)   ;;  %v3763_v45 = vld [vmem:[%s6206_s1 + $0x88] sm:$0xff] (!%p3070_p5)  }
  0x21   : > { %v3764_v46 = vld [vmem:[%s6206_s1 + $0x288] sm:$0xff] (!%p3070_p5)   ;;  %v3765_v47 = vld [vmem:[%s6206_s1 + $0x90] sm:$0xff] (!%p3070_p5)   ;;  %v3767_v49 = vld [vmem:[%s6206_s1 + $0x98] sm:$0xff] (!%p3070_p5)  }
  0x22   : > { %v3766_v48 = vld [vmem:[%s6206_s1 + $0x290] sm:$0xff] (!%p3070_p5)   ;;  %v3768_v50 = vld [vmem:[%s6206_s1 + $0x298] sm:$0xff] (!%p3070_p5)   ;;  %v3769_v51 = vld [vmem:[%s6206_s1 + $0xa0] sm:$0xff] (!%p3070_p5)  }
  0x23   : > { %v3770_v52 = vld [vmem:[%s6206_s1 + $0x2a0] sm:$0xff] (!%p3070_p5)   ;;  %v3771_v53 = vld [vmem:[%s6206_s1 + $0xa8] sm:$0xff] (!%p3070_p5)   ;;  %v3773_v55 = vld [vmem:[%s6206_s1 + $0xb0] sm:$0xff] (!%p3070_p5)  }
  0x24   : > { %v3772_v54 = vld [vmem:[%s6206_s1 + $0x2a8] sm:$0xff] (!%p3070_p5)   ;;  %v3774_v56 = vld [vmem:[%s6206_s1 + $0x2b0] sm:$0xff] (!%p3070_p5)   ;;  %v3775_v57 = vld [vmem:[%s6206_s1 + $0xb8] sm:$0xff] (!%p3070_p5)  }
  0x25   : > { %v3776_v58 = vld [vmem:[%s6206_s1 + $0x2b8] sm:$0xff] (!%p3070_p5)   ;;  %v3777_v59 = vld [vmem:[%s6206_s1 + $0xc0] sm:$0xff] (!%p3070_p5)   ;;  %v3779_v61 = vld [vmem:[%s6206_s1 + $0xc8] sm:$0xff] (!%p3070_p5)  }
  0x26   : > { %v3778_v60 = vld [vmem:[%s6206_s1 + $0x2c0] sm:$0xff] (!%p3070_p5)   ;;  %v3780_v62 = vld [vmem:[%s6206_s1 + $0x2c8] sm:$0xff] (!%p3070_p5)   ;;  %v3781_v63 = vld [vmem:[%s6206_s1 + $0xd0] sm:$0xff] (!%p3070_p5)  }
  0x27   : > { %v3782_v0 = vld [vmem:[%s6206_s1 + $0x2d0] sm:$0xff] (!%p3070_p5)   ;;  %v3783_v1 = vld [vmem:[%s6206_s1 + $0xd8] sm:$0xff] (!%p3070_p5)   ;;  %v3785_v3 = vld [vmem:[%s6206_s1 + $0xe0] sm:$0xff] (!%p3070_p5)  }
  0x28   : > { %v3784_v2 = vld [vmem:[%s6206_s1 + $0x2d8] sm:$0xff] (!%p3070_p5)  }
  0x29   : > { %v3791_v9 = vld [vmem:[%s6206_s1 + $0xf8] sm:$0xff] (!%p3070_p5)  }
  0x2a   : > { %v3792_v10 = vld [vmem:[%s6206_s1 + $0x2f8] sm:$0xff] (!%p3070_p5)  }
  0xa1   : > { %177 = sbr.rel (%p3070_p5) target bundleno = 649 (0x289), region = 40 }
  0xa4   : > { %v170_v5 = vpop.xlane.xlu0 %169 }
  0xa5   : > { %v171_v6 = vadd.f32 %v170_v5, %v165_v4  ;;  %v3786_v4 = vld [vmem:[%s6206_s1 + $0x2e0] sm:$0xff] (!%p3070_p5)   ;;  %v3787_v5 = vld [vmem:[%s6206_s1 + $0xe8] sm:$0xff] (!%p3070_p5)  }
  0xa7   : > { %173 = vst.msk [vmem:[#allocation2] sm:$0xff] %vm172_vm1, %v171_v6  ;;  %v3788_v6 = vld [vmem:[%s6206_s1 + $0x2e8] sm:$0xff] (!%p3070_p5)  }
  0xae   : > { %v178_v7 = vld [vmem:[#allocation2] sm:$0xff] }
  0xaf   : > { %v179_v8 = vmul.f32 0.0009765625, %v178_v7  ;;  %v3789_v7 = vld [vmem:[%s6206_s1 + $0xf0] sm:$0xff]  }
  0xb1   : > { %v180_v11 = vpack.c.bf16 %v179_v8, %v179_v8  ;;  %v3790_v8 = vld [vmem:[%s6206_s1 + $0x2f0] sm:$0xff]  }
  0xb3   : > { %3718 = vmatprep.subr.msk.bf16.mxu0 %vm1718_vm2, %v180_v11  ;;  %3719 = vmatprep.subr.msk.bf16.mxu1 %vm1718_vm2, %v180_v11  ;;  %v1720_v14 = vsel %vm1718_vm2, %v180_v11, 0  ;;  %v3793_v11 = vld [vmem:[%s6206_s1 + $0x100] sm:$0xff]  }
  0xb4   : > { %3459 = vmatpush3.bf16.msra.mxu0 %v1720_v14  ;;  %3717 = vmatpush3.bf16.msra.mxu1 %v1720_v14  ;;  %v3796_v14 = vld [vmem:[%s6206_s1 + $0x308] sm:$0xff]  }
  0xb7   : > { %3461 = vmatmul.mubr.msk.bf16.vlgmr.msra.gmra.mrb[0].mxu0 %vm1333_vm3, %v3731_v12  ;;  %3589 = vmatmul.mubr.msk.bf16.vlgmr.msra.gmra.mrb[0].mxu1 %vm1333_vm3, %v3732_v13  ;;  %v3794_v12 = vld [vmem:[%s6206_s1 + $0x300] sm:$0xff]   ;;  %v3795_v13 = vld [vmem:[%s6206_s1 + $0x108] sm:$0xff]  }
  0xb8   : > { %3464 = vmatprep.mubr.msk.bf16.mxu0 %vm1333_vm3, %v3733_v15  ;;  %3592 = vmatprep.mubr.msk.bf16.mxu1 %vm1333_vm3, %v3734_v16  ;;  %v3797_v15 = vld [vmem:[%s6206_s1 + $0x110] sm:$0xff]  }
  0xb9   : > { %v3798_v16 = vld [vmem:[%s6206_s1 + $0x310] sm:$0xff]  }
  0xbf   : > { %3465 = vmatmul.mubr.msk.bf16.gmra.mrb[4].mxu0 %vm1333_vm3, %v3735_v17  ;;  %3593 = vmatmul.mubr.msk.bf16.gmra.mrb[4].mxu1 %vm1333_vm3, %v3736_v18  ;;  %v3799_v17 = vld [vmem:[%s6206_s1 + $0x118] sm:$0xff]  }
  0xc0   : > { %3468 = vmatprep.mubr.msk.bf16.mxu0 %vm1333_vm3, %v3737_v19  ;;  %3596 = vmatprep.mubr.msk.bf16.mxu1 %vm1333_vm3, %v3738_v20  ;;  %v3800_v18 = vld [vmem:[%s6206_s1 + $0x318] sm:$0xff]   ;;  %v3801_v19 = vld [vmem:[%s6206_s1 + $0x120] sm:$0xff]  }
  0xc1   : > { %v3802_v20 = vld [vmem:[%s6206_s1 + $0x320] sm:$0xff]  }
  0xc7   : > { %3469 = vmatmul.mubr.msk.bf16.gmra.mrb[8].mxu0 %vm1333_vm3, %v3739_v21  ;;  %3597 = vmatmul.mubr.msk.bf16.gmra.mrb[8].mxu1 %vm1333_vm3, %v3740_v22  ;;  %v3803_v21 = vld [vmem:[%s6206_s1 + $0x128] sm:$0xff]  }
  0xc8   : > { %3472 = vmatprep.mubr.msk.bf16.mxu0 %vm1333_vm3, %v3741_v23  ;;  %3600 = vmatprep.mubr.msk.bf16.mxu1 %vm1333_vm3, %v3742_v24  ;;  %v3804_v22 = vld [vmem:[%s6206_s1 + $0x328] sm:$0xff]   ;;  %v3805_v23 = vld [vmem:[%s6206_s1 + $0x130] sm:$0xff]  }
  0xc9   : > { %v3806_v24 = vld [vmem:[%s6206_s1 + $0x330] sm:$0xff]  }
  0xcf   : > { %3473 = vmatmul.mubr.msk.bf16.gmra.mrb[12].mxu0 %vm1333_vm3, %v3743_v25  ;;  %3601 = vmatmul.mubr.msk.bf16.gmra.mrb[12].mxu1 %vm1333_vm3, %v3744_v26  ;;  %v3807_v25 = vld [vmem:[%s6206_s1 + $0x138] sm:$0xff]  }
  0xd0   : > { %3476 = vmatprep.mubr.msk.bf16.mxu0 %vm1333_vm3, %v3745_v27  ;;  %3604 = vmatprep.mubr.msk.bf16.mxu1 %vm1333_vm3, %v3746_v28  ;;  %v3808_v26 = vld [vmem:[%s6206_s1 + $0x338] sm:$0xff]   ;;  %v3809_v27 = vld [vmem:[%s6206_s1 + $0x140] sm:$0xff]  }
  0xd1   : > { %v3810_v28 = vld [vmem:[%s6206_s1 + $0x340] sm:$0xff]  }
  0xd7   : > { %3477 = vmatmul.mubr.msk.bf16.gmra.mrb[16].mxu0 %vm1333_vm3, %v3747_v29  ;;  %3605 = vmatmul.mubr.msk.bf16.gmra.mrb[16].mxu1 %vm1333_vm3, %v3748_v30  ;;  %v3811_v29 = vld [vmem:[%s6206_s1 + $0x148] sm:$0xff]  }
  0xd8   : > { %3480 = vmatprep.mubr.msk.bf16.mxu0 %vm1333_vm3, %v3749_v31  ;;  %3608 = vmatprep.mubr.msk.bf16.mxu1 %vm1333_vm3, %v3750_v32  ;;  %v3812_v30 = vld [vmem:[%s6206_s1 + $0x348] sm:$0xff]   ;;  %v3813_v31 = vld [vmem:[%s6206_s1 + $0x150] sm:$0xff]  }
  0xd9   : > { %v3814_v32 = vld [vmem:[%s6206_s1 + $0x350] sm:$0xff]  }
  0xdf   : > { %3481 = vmatmul.mubr.msk.bf16.gmra.mrb[20].mxu0 %vm1333_vm3, %v3751_v33  ;;  %3609 = vmatmul.mubr.msk.bf16.gmra.mrb[20].mxu1 %vm1333_vm3, %v3752_v34  ;;  %v3815_v33 = vld [vmem:[%s6206_s1 + $0x158] sm:$0xff]  }
  0xe0   : > { %3484 = vmatprep.mubr.msk.bf16.mxu0 %vm1333_vm3, %v3753_v35  ;;  %3612 = vmatprep.mubr.msk.bf16.mxu1 %vm1333_vm3, %v3754_v36  ;;  %v3816_v34 = vld [vmem:[%s6206_s1 + $0x358] sm:$0xff]   ;;  %v3817_v35 = vld [vmem:[%s6206_s1 + $0x160] sm:$0xff]  }
  0xe1   : > { %v3818_v36 = vld [vmem:[%s6206_s1 + $0x360] sm:$0xff]  }
  0xe7   : > { %3485 = vmatmul.mubr.msk.bf16.gmra.mrb[24].mxu0 %vm1333_vm3, %v3755_v37  ;;  %3613 = vmatmul.mubr.msk.bf16.gmra.mrb[24].mxu1 %vm1333_vm3, %v3756_v38  ;;  %v3819_v37 = vld [vmem:[%s6206_s1 + $0x168] sm:$0xff]  }
  0xe8   : > { %3488 = vmatprep.mubr.msk.bf16.mxu0 %vm1333_vm3, %v3757_v39  ;;  %3616 = vmatprep.mubr.msk.bf16.mxu1 %vm1333_vm3, %v3758_v40  ;;  %v3820_v38 = vld [vmem:[%s6206_s1 + $0x368] sm:$0xff]   ;;  %v3821_v39 = vld [vmem:[%s6206_s1 + $0x170] sm:$0xff]  }
  0xe9   : > { %v3822_v40 = vld [vmem:[%s6206_s1 + $0x370] sm:$0xff]  }
  0xef   : > { %3489 = vmatmul.mubr.msk.bf16.gmra.mrb[28].mxu0 %vm1333_vm3, %v3759_v41  ;;  %3617 = vmatmul.mubr.msk.bf16.gmra.mrb[28].mxu1 %vm1333_vm3, %v3760_v42  ;;  %v3823_v41 = vld [vmem:[%s6206_s1 + $0x178] sm:$0xff]  }
  0xf0   : > { %3492 = vmatprep.mubr.msk.bf16.mxu0 %vm1333_vm3, %v3761_v43  ;;  %3620 = vmatprep.mubr.msk.bf16.mxu1 %vm1333_vm3, %v3762_v44  ;;  %v3824_v42 = vld [vmem:[%s6206_s1 + $0x378] sm:$0xff]   ;;  %v3825_v43 = vld [vmem:[%s6206_s1 + $0x180] sm:$0xff]  }
  0xf1   : > { %v3826_v44 = vld [vmem:[%s6206_s1 + $0x380] sm:$0xff]  }
  0xf7   : > { %3493 = vmatmul.mubr.msk.bf16.gmra.mrb[32].mxu0 %vm1333_vm3, %v3763_v45  ;;  %3621 = vmatmul.mubr.msk.bf16.gmra.mrb[32].mxu1 %vm1333_vm3, %v3764_v46  ;;  %v3827_v45 = vld [vmem:[%s6206_s1 + $0x188] sm:$0xff]  }
  0xf8   : > { %3496 = vmatprep.mubr.msk.bf16.mxu0 %vm1333_vm3, %v3765_v47  ;;  %3624 = vmatprep.mubr.msk.bf16.mxu1 %vm1333_vm3, %v3766_v48  ;;  %v3828_v46 = vld [vmem:[%s6206_s1 + $0x388] sm:$0xff]   ;;  %v3829_v47 = vld [vmem:[%s6206_s1 + $0x190] sm:$0xff]  }
  0xf9   : > { %v3830_v48 = vld [vmem:[%s6206_s1 + $0x390] sm:$0xff]  }
  0xff   : > { %3497 = vmatmul.mubr.msk.bf16.gmra.mrb[36].mxu0 %vm1333_vm3, %v3767_v49  ;;  %3625 = vmatmul.mubr.msk.bf16.gmra.mrb[36].mxu1 %vm1333_vm3, %v3768_v50  ;;  %v3831_v49 = vld [vmem:[%s6206_s1 + $0x198] sm:$0xff]  }
 0x100   : > { %3500 = vmatprep.mubr.msk.bf16.mxu0 %vm1333_vm3, %v3769_v51  ;;  %3628 = vmatprep.mubr.msk.bf16.mxu1 %vm1333_vm3, %v3770_v52  ;;  %v3832_v50 = vld [vmem:[%s6206_s1 + $0x398] sm:$0xff]   ;;  %v3833_v51 = vld [vmem:[%s6206_s1 + $0x1a0] sm:$0xff]  }
 0x101   : > { %v3834_v52 = vld [vmem:[%s6206_s1 + $0x3a0] sm:$0xff]  }
 0x107   : > { %3501 = vmatmul.mubr.msk.bf16.gmra.mrb[40].mxu0 %vm1333_vm3, %v3771_v53  ;;  %3629 = vmatmul.mubr.msk.bf16.gmra.mrb[40].mxu1 %vm1333_vm3, %v3772_v54  ;;  %v3835_v53 = vld [vmem:[%s6206_s1 + $0x1a8] sm:$0xff]  }
 0x108   : > { %3504 = vmatprep.mubr.msk.bf16.mxu0 %vm1333_vm3, %v3773_v55  ;;  %3632 = vmatprep.mubr.msk.bf16.mxu1 %vm1333_vm3, %v3774_v56  ;;  %v3836_v54 = vld [vmem:[%s6206_s1 + $0x3a8] sm:$0xff]   ;;  %v3837_v55 = vld [vmem:[%s6206_s1 + $0x1b0] sm:$0xff]  }
 0x109   : > { %v3838_v56 = vld [vmem:[%s6206_s1 + $0x3b0] sm:$0xff]  }
 0x10f   : > { %3505 = vmatmul.mubr.msk.bf16.gmra.mrb[44].mxu0 %vm1333_vm3, %v3775_v57  ;;  %3633 = vmatmul.mubr.msk.bf16.gmra.mrb[44].mxu1 %vm1333_vm3, %v3776_v58  ;;  %v439_v57 = vld [vmem:[%s6207_s2 + $0x10] sm:$0xff] }
 0x110   : > { %3508 = vmatprep.mubr.msk.bf16.mxu0 %vm1333_vm3, %v3777_v59  ;;  %3636 = vmatprep.mubr.msk.bf16.mxu1 %vm1333_vm3, %v3778_v60  ;;  %v567_v58 = vld [vmem:[%s6207_s2 + $0x410] sm:$0xff]  ;;  %v437_v59 = vld [vmem:[%s6207_s2] sm:$0xff] }
 0x111   : > { %v565_v60 = vld [vmem:[%s6207_s2 + $0x400] sm:$0xff] }
 0x117   : > { %3509 = vmatmul.mubr.msk.bf16.gmra.mrb[48].mxu0 %vm1333_vm3, %v3779_v61  ;;  %3637 = vmatmul.mubr.msk.bf16.gmra.mrb[48].mxu1 %vm1333_vm3, %v3780_v62 }
 0x118   : > { %3512 = vmatprep.mubr.msk.bf16.mxu0 %vm1333_vm3, %v3781_v63  ;;  %3640 = vmatprep.mubr.msk.bf16.mxu1 %vm1333_vm3, %v3782_v0  ;;  %v440_v63 = vld [vmem:[%s6207_s2 + $0x18] sm:$0xff] }
 0x119   : > { %v568_v0 = vld [vmem:[%s6207_s2 + $0x418] sm:$0xff] }
 0x11f   : > { %3513 = vmatmul.mubr.msk.bf16.gmra.mrb[52].mxu0 %vm1333_vm3, %v3783_v1  ;;  %3641 = vmatmul.mubr.msk.bf16.gmra.mrb[52].mxu1 %vm1333_vm3, %v3784_v2  ;;  %v438_v1 = vld [vmem:[%s6207_s2 + $0x8] sm:$0xff] }
 0x120   : > { %3516 = vmatprep.mubr.msk.bf16.mxu0 %vm1333_vm3, %v3785_v3  ;;  %3644 = vmatprep.mubr.msk.bf16.mxu1 %vm1333_vm3, %v3786_v4 }
 0x127   : > { %3517 = vmatmul.mubr.msk.bf16.gmra.mrb[56].mxu0 %vm1333_vm3, %v3787_v5  ;;  %3645 = vmatmul.mubr.msk.bf16.gmra.mrb[56].mxu1 %vm1333_vm3, %v3788_v6  ;;  %v566_v6 = vld [vmem:[%s6207_s2 + $0x408] sm:$0xff] }
 0x128   : > { %3520 = vmatprep.mubr.msk.bf16.mxu0 %vm1333_vm3, %v3789_v7  ;;  %3648 = vmatprep.mubr.msk.bf16.mxu1 %vm1333_vm3, %v3790_v8  ;;  %v3839_v7 = vld [vmem:[%s6206_s1 + $0x1b8] sm:$0xff]  }
 0x129   : > { %v3840_v8 = vld [vmem:[%s6206_s1 + $0x3b8] sm:$0xff]  }
 0x12f   : > { %3521 = vmatmul.mubr.msk.bf16.gmra.mrb[60].mxu0 %vm1333_vm3, %v3791_v9  ;;  %3649 = vmatmul.mubr.msk.bf16.gmra.mrb[60].mxu1 %vm1333_vm3, %v3792_v10 }
 0x130   : > { %3524 = vmatprep.mubr.msk.bf16.mxu0 %vm1333_vm3, %v3793_v11  ;;  %3652 = vmatprep.mubr.msk.bf16.mxu1 %vm1333_vm3, %v3794_v12 }
 0x137   : > { %3525 = vmatmul.mubr.msk.bf16.gmra.mrb[64].mxu0 %vm1333_vm3, %v3795_v13  ;;  %3653 = vmatmul.mubr.msk.bf16.gmra.mrb[64].mxu1 %vm1333_vm3, %v3796_v14  ;;  %v3841_v13 = vld [vmem:[%s6206_s1 + $0x1c0] sm:$0xff]  }
 0x138   : > { %3528 = vmatprep.mubr.msk.bf16.mxu0 %vm1333_vm3, %v3797_v15  ;;  %3656 = vmatprep.mubr.msk.bf16.mxu1 %vm1333_vm3, %v3798_v16  ;;  %v3842_v14 = vld [vmem:[%s6206_s1 + $0x3c0] sm:$0xff]  }
 0x13f   : > { %3529 = vmatmul.mubr.msk.bf16.gmra.mrb[68].mxu0 %vm1333_vm3, %v3799_v17  ;;  %3657 = vmatmul.mubr.msk.bf16.gmra.mrb[68].mxu1 %vm1333_vm3, %v3800_v18 }
 0x140   : > { %3532 = vmatprep.mubr.msk.bf16.mxu0 %vm1333_vm3, %v3801_v19  ;;  %3660 = vmatprep.mubr.msk.bf16.mxu1 %vm1333_vm3, %v3802_v20 }
 0x147   : > { %3533 = vmatmul.mubr.msk.bf16.gmra.mrb[72].mxu0 %vm1333_vm3, %v3803_v21  ;;  %3661 = vmatmul.mubr.msk.bf16.gmra.mrb[72].mxu1 %vm1333_vm3, %v3804_v22  ;;  %v443_v21 = vld [vmem:[%s6207_s2 + $0x30] sm:$0xff] }
 0x148   : > { %3536 = vmatprep.mubr.msk.bf16.mxu0 %vm1333_vm3, %v3805_v23  ;;  %3664 = vmatprep.mubr.msk.bf16.mxu1 %vm1333_vm3, %v3806_v24  ;;  %v571_v22 = vld [vmem:[%s6207_s2 + $0x430] sm:$0xff]  ;;  %v441_v23 = vld [vmem:[%s6207_s2 + $0x20] sm:$0xff] }
 0x149   : > { %v569_v24 = vld [vmem:[%s6207_s2 + $0x420] sm:$0xff] }
 0x14f   : > { %3537 = vmatmul.mubr.msk.bf16.gmra.mrb[76].mxu0 %vm1333_vm3, %v3807_v25  ;;  %3665 = vmatmul.mubr.msk.bf16.gmra.mrb[76].mxu1 %vm1333_vm3, %v3808_v26 }
 0x150   : > { %3540 = vmatprep.mubr.msk.bf16.mxu0 %vm1333_vm3, %v3809_v27  ;;  %3668 = vmatprep.mubr.msk.bf16.mxu1 %vm1333_vm3, %v3810_v28  ;;  %v444_v27 = vld [vmem:[%s6207_s2 + $0x38] sm:$0xff] }
 0x151   : > { %v572_v28 = vld [vmem:[%s6207_s2 + $0x438] sm:$0xff] }
 0x157   : > { %3541 = vmatmul.mubr.msk.bf16.gmra.mrb[80].mxu0 %vm1333_vm3, %v3811_v29  ;;  %3669 = vmatmul.mubr.msk.bf16.gmra.mrb[80].mxu1 %vm1333_vm3, %v3812_v30  ;;  %v442_v29 = vld [vmem:[%s6207_s2 + $0x28] sm:$0xff] }
 0x158   : > { %3544 = vmatprep.mubr.msk.bf16.mxu0 %vm1333_vm3, %v3813_v31  ;;  %3672 = vmatprep.mubr.msk.bf16.mxu1 %vm1333_vm3, %v3814_v32 }
 0x15f   : > { %3545 = vmatmul.mubr.msk.bf16.gmra.mrb[84].mxu0 %vm1333_vm3, %v3815_v33  ;;  %3673 = vmatmul.mubr.msk.bf16.gmra.mrb[84].mxu1 %vm1333_vm3, %v3816_v34  ;;  %v570_v34 = vld [vmem:[%s6207_s2 + $0x428] sm:$0xff] }
 0x160   : > { %3548 = vmatprep.mubr.msk.bf16.mxu0 %vm1333_vm3, %v3817_v35  ;;  %3676 = vmatprep.mubr.msk.bf16.mxu1 %vm1333_vm3, %v3818_v36  ;;  %v3843_v35 = vld [vmem:[%s6206_s1 + $0x1c8] sm:$0xff]  }
 0x161   : > { %v3844_v36 = vld [vmem:[%s6206_s1 + $0x3c8] sm:$0xff]  }
 0x167   : > { %3549 = vmatmul.mubr.msk.bf16.gmra.mrb[88].mxu0 %vm1333_vm3, %v3819_v37  ;;  %3677 = vmatmul.mubr.msk.bf16.gmra.mrb[88].mxu1 %vm1333_vm3, %v3820_v38 }
 0x168   : > { %3552 = vmatprep.mubr.msk.bf16.mxu0 %vm1333_vm3, %v3821_v39  ;;  %3680 = vmatprep.mubr.msk.bf16.mxu1 %vm1333_vm3, %v3822_v40 }
 0x16f   : > { %3553 = vmatmul.mubr.msk.bf16.gmra.mrb[92].mxu0 %vm1333_vm3, %v3823_v41  ;;  %3681 = vmatmul.mubr.msk.bf16.gmra.mrb[92].mxu1 %vm1333_vm3, %v3824_v42  ;;  %v3845_v41 = vld [vmem:[%s6206_s1 + $0x1d0] sm:$0xff]  }
 0x170   : > { %3556 = vmatprep.mubr.msk.bf16.mxu0 %vm1333_vm3, %v3825_v43  ;;  %3684 = vmatprep.mubr.msk.bf16.mxu1 %vm1333_vm3, %v3826_v44  ;;  %v3846_v42 = vld [vmem:[%s6206_s1 + $0x3d0] sm:$0xff]  }
 0x177   : > { %3557 = vmatmul.mubr.msk.bf16.gmra.mrb[96].mxu0 %vm1333_vm3, %v3827_v45  ;;  %3685 = vmatmul.mubr.msk.bf16.gmra.mrb[96].mxu1 %vm1333_vm3, %v3828_v46 }
 0x178   : > { %3560 = vmatprep.mubr.msk.bf16.mxu0 %vm1333_vm3, %v3829_v47  ;;  %3688 = vmatprep.mubr.msk.bf16.mxu1 %vm1333_vm3, %v3830_v48 }
 0x17f   : > { %3561 = vmatmul.mubr.msk.bf16.gmra.mrb[100].mxu0 %vm1333_vm3, %v3831_v49  ;;  %3689 = vmatmul.mubr.msk.bf16.gmra.mrb[100].mxu1 %vm1333_vm3, %v3832_v50  ;;  %v447_v49 = vld [vmem:[%s6207_s2 + $0x50] sm:$0xff] }
 0x180   : > { %3564 = vmatprep.mubr.msk.bf16.mxu0 %vm1333_vm3, %v3833_v51  ;;  %3692 = vmatprep.mubr.msk.bf16.mxu1 %vm1333_vm3, %v3834_v52  ;;  %v575_v50 = vld [vmem:[%s6207_s2 + $0x450] sm:$0xff]  ;;  %v445_v51 = vld [vmem:[%s6207_s2 + $0x40] sm:$0xff] }
 0x181   : > { %v573_v52 = vld [vmem:[%s6207_s2 + $0x440] sm:$0xff] }
 0x187   : > { %3565 = vmatmul.mubr.msk.bf16.gmra.mrb[104].mxu0 %vm1333_vm3, %v3835_v53  ;;  %3693 = vmatmul.mubr.msk.bf16.gmra.mrb[104].mxu1 %vm1333_vm3, %v3836_v54 }
 0x188   : > { %3568 = vmatprep.mubr.msk.bf16.mxu0 %vm1333_vm3, %v3837_v55  ;;  %3696 = vmatprep.mubr.msk.bf16.mxu1 %vm1333_vm3, %v3838_v56  ;;  %v448_v55 = vld [vmem:[%s6207_s2 + $0x58] sm:$0xff] }
 0x189   : > { %v576_v56 = vld [vmem:[%s6207_s2 + $0x458] sm:$0xff] }
 0x18a   : > { %v3462_v61 = vpop.f32.mrb[0].mxu0  ;;  %v3590_v62 = vpop.f32.mrb[0].mxu1 }
 0x18b   : > { %v1765_v2 = vadd.f32 %v3462_v61, %v439_v57  ;;  %v2277_v3 = vadd.f32 %v3590_v62, %v567_v58  ;;  %v1756_v4 = vpop.f32.mrb[1].mxu0  ;;  %v2268_v5 = vpop.f32.mrb[1].mxu1  ;;  %v446_v57 = vld [vmem:[%s6207_s2 + $0x48] sm:$0xff] }
 0x18c   : > { %v1757_v9 = vadd.f32 %v1756_v4, %v437_v59  ;;  %v2269_v10 = vadd.f32 %v2268_v5, %v565_v60  ;;  %v3463_v11 = vpop.f32.mrb[2].mxu0  ;;  %v3591_v12 = vpop.f32.mrb[2].mxu1  ;;  %v574_v62 = vld [vmem:[%s6207_s2 + $0x448] sm:$0xff]  ;;  %v3849_v5 = vld [vmem:[%s6206_s1 + $0x1e0] sm:$0xff]  }
 0x18d   : > { %2781 = vst.msk [vmem:[%s6208_s3 + $0x10] sm:$0xff] %vm172_vm1, %v1765_v2  ;;  %2909 = vst.msk [vmem:[%s6208_s3 + $0x410] sm:$0xff] %vm172_vm1, %v2277_v3  ;;  %v1768_v15 = vadd.f32 %v3463_v11, %v440_v63  ;;  %v2280_v16 = vadd.f32 %v3591_v12, %v568_v0  ;;  %v1759_v17 = vpop.f32.mrb[3].mxu0  ;;  %v2271_v18 = vpop.f32.mrb[3].mxu1  ;;  %v3847_v63 = vld [vmem:[%s6206_s1 + $0x1d8] sm:$0xff]  }
 0x18e   : > { %2779 = vst.msk [vmem:[%s6208_s3] sm:$0xff] %vm172_vm1, %v1757_v9  ;;  %2907 = vst.msk [vmem:[%s6208_s3 + $0x400] sm:$0xff] %vm172_vm1, %v2269_v10  ;;  %v1760_v19 = vadd.f32 %v1759_v17, %v438_v1  ;;  %v2272_v20 = vadd.f32 %v2271_v18, %v566_v6  ;;  %v3848_v0 = vld [vmem:[%s6206_s1 + $0x3d8] sm:$0xff]   ;;  %v3850_v6 = vld [vmem:[%s6206_s1 + $0x3e0] sm:$0xff]  }
 0x18f   : > { %2782 = vst.msk [vmem:[%s6208_s3 + $0x18] sm:$0xff] %vm172_vm1, %v1768_v15  ;;  %2910 = vst.msk [vmem:[%s6208_s3 + $0x418] sm:$0xff] %vm172_vm1, %v2280_v16  ;;  %3569 = vmatmul.mubr.msk.bf16.gmra.mrb[108].mxu0 %vm1333_vm3, %v3839_v7  ;;  %3697 = vmatmul.mubr.msk.bf16.gmra.mrb[108].mxu1 %vm1333_vm3, %v3840_v8  ;;  %v449_v15 = vld [vmem:[%s6207_s2 + $0x60] sm:$0xff] }
 0x190   : > { %2780 = vst.msk [vmem:[%s6208_s3 + $0x8] sm:$0xff] %vm172_vm1, %v1760_v19  ;;  %2908 = vst.msk [vmem:[%s6208_s3 + $0x408] sm:$0xff] %vm172_vm1, %v2272_v20  ;;  %3572 = vmatprep.mubr.msk.bf16.mxu0 %vm1333_vm3, %v3841_v13  ;;  %3700 = vmatprep.mubr.msk.bf16.mxu1 %vm1333_vm3, %v3842_v14  ;;  %v451_v13 = vld [vmem:[%s6207_s2 + $0x70] sm:$0xff]  ;;  %v577_v16 = vld [vmem:[%s6207_s2 + $0x460] sm:$0xff] }
 0x191   : > { %v579_v14 = vld [vmem:[%s6207_s2 + $0x470] sm:$0xff]  ;;  %v452_v19 = vld [vmem:[%s6207_s2 + $0x78] sm:$0xff] }
 0x192   : > { %v3466_v25 = vpop.f32.mrb[4].mxu0  ;;  %v3594_v26 = vpop.f32.mrb[4].mxu1  ;;  %v580_v20 = vld [vmem:[%s6207_s2 + $0x478] sm:$0xff] }
 0x193   : > { %v1781_v30 = vadd.f32 %v3466_v25, %v443_v21  ;;  %v2293_v31 = vadd.f32 %v3594_v26, %v571_v22  ;;  %v1772_v32 = vpop.f32.mrb[5].mxu0  ;;  %v2284_v33 = vpop.f32.mrb[5].mxu1  ;;  %v450_v21 = vld [vmem:[%s6207_s2 + $0x68] sm:$0xff] }
 0x194   : > { %v1773_v37 = vadd.f32 %v1772_v32, %v441_v23  ;;  %v2285_v38 = vadd.f32 %v2284_v33, %v569_v24  ;;  %v3467_v39 = vpop.f32.mrb[6].mxu0  ;;  %v3595_v40 = vpop.f32.mrb[6].mxu1  ;;  %v578_v26 = vld [vmem:[%s6207_s2 + $0x468] sm:$0xff]  ;;  %v3853_v33 = vld [vmem:[%s6206_s1 + $0x1f0] sm:$0xff]  }
 0x195   : > { %2785 = vst.msk [vmem:[%s6208_s3 + $0x30] sm:$0xff] %vm172_vm1, %v1781_v30  ;;  %2913 = vst.msk [vmem:[%s6208_s3 + $0x430] sm:$0xff] %vm172_vm1, %v2293_v31  ;;  %v1784_v43 = vadd.f32 %v3467_v39, %v444_v27  ;;  %v2296_v44 = vadd.f32 %v3595_v40, %v572_v28  ;;  %v1775_v45 = vpop.f32.mrb[7].mxu0  ;;  %v2287_v46 = vpop.f32.mrb[7].mxu1  ;;  %v3851_v27 = vld [vmem:[%s6206_s1 + $0x1e8] sm:$0xff]  }
 0x196   : > { %2783 = vst.msk [vmem:[%s6208_s3 + $0x20] sm:$0xff] %vm172_vm1, %v1773_v37  ;;  %2911 = vst.msk [vmem:[%s6208_s3 + $0x420] sm:$0xff] %vm172_vm1, %v2285_v38  ;;  %v1776_v47 = vadd.f32 %v1775_v45, %v442_v29  ;;  %v2288_v48 = vadd.f32 %v2287_v46, %v570_v34  ;;  %v3852_v28 = vld [vmem:[%s6206_s1 + $0x3e8] sm:$0xff]   ;;  %v3854_v34 = vld [vmem:[%s6206_s1 + $0x3f0] sm:$0xff]  }
 0x197   : > { %2786 = vst.msk [vmem:[%s6208_s3 + $0x38] sm:$0xff] %vm172_vm1, %v1784_v43  ;;  %2914 = vst.msk [vmem:[%s6208_s3 + $0x438] sm:$0xff] %vm172_vm1, %v2296_v44  ;;  %3573 = vmatmul.mubr.msk.bf16.gmra.mrb[112].mxu0 %vm1333_vm3, %v3843_v35  ;;  %3701 = vmatmul.mubr.msk.bf16.gmra.mrb[112].mxu1 %vm1333_vm3, %v3844_v36  ;;  %v453_v43 = vld [vmem:[%s6207_s2 + $0x80] sm:$0xff] }
 0x198   : > { %2784 = vst.msk [vmem:[%s6208_s3 + $0x28] sm:$0xff] %vm172_vm1, %v1776_v47  ;;  %2912 = vst.msk [vmem:[%s6208_s3 + $0x428] sm:$0xff] %vm172_vm1, %v2288_v48  ;;  %3576 = vmatprep.mubr.msk.bf16.mxu0 %vm1333_vm3, %v3845_v41  ;;  %3704 = vmatprep.mubr.msk.bf16.mxu1 %vm1333_vm3, %v3846_v42  ;;  %v455_v41 = vld [vmem:[%s6207_s2 + $0x90] sm:$0xff]  ;;  %v581_v44 = vld [vmem:[%s6207_s2 + $0x480] sm:$0xff] }
 0x199   : > { %v583_v42 = vld [vmem:[%s6207_s2 + $0x490] sm:$0xff]  ;;  %v456_v47 = vld [vmem:[%s6207_s2 + $0x98] sm:$0xff] }
 0x19a   : > { %v3470_v53 = vpop.f32.mrb[8].mxu0  ;;  %v3598_v54 = vpop.f32.mrb[8].mxu1  ;;  %v584_v48 = vld [vmem:[%s6207_s2 + $0x498] sm:$0xff] }
 0x19b   : > { %v1797_v58 = vadd.f32 %v3470_v53, %v447_v49  ;;  %v2309_v59 = vadd.f32 %v3598_v54, %v575_v50  ;;  %v1788_v60 = vpop.f32.mrb[9].mxu0  ;;  %v2300_v61 = vpop.f32.mrb[9].mxu1  ;;  %v454_v49 = vld [vmem:[%s6207_s2 + $0x88] sm:$0xff] }
 0x19c   : > { %v1789_v1 = vadd.f32 %v1788_v60, %v445_v51  ;;  %v2301_v2 = vadd.f32 %v2300_v61, %v573_v52  ;;  %v3471_v3 = vpop.f32.mrb[10].mxu0  ;;  %v3599_v4 = vpop.f32.mrb[10].mxu1  ;;  %v582_v54 = vld [vmem:[%s6207_s2 + $0x488] sm:$0xff] }
 0x19d   : > { %2789 = vst.msk [vmem:[%s6208_s3 + $0x50] sm:$0xff] %vm172_vm1, %v1797_v58  ;;  %2917 = vst.msk [vmem:[%s6208_s3 + $0x450] sm:$0xff] %vm172_vm1, %v2309_v59  ;;  %v1800_v7 = vadd.f32 %v3471_v3, %v448_v55  ;;  %v2312_v8 = vadd.f32 %v3599_v4, %v576_v56  ;;  %v1791_v9 = vpop.f32.mrb[11].mxu0  ;;  %v2303_v10 = vpop.f32.mrb[11].mxu1  ;;  %v3855_v55 = vld [vmem:[%s6206_s1 + $0x1f8] sm:$0xff]   ;;  %v459_v3 = vld [vmem:[%s6207_s2 + $0xb0] sm:$0xff] }
 0x19e   : > { %2787 = vst.msk [vmem:[%s6208_s3 + $0x40] sm:$0xff] %vm172_vm1, %v1789_v1  ;;  %2915 = vst.msk [vmem:[%s6208_s3 + $0x440] sm:$0xff] %vm172_vm1, %v2301_v2  ;;  %v1792_v11 = vadd.f32 %v1791_v9, %v446_v57  ;;  %v2304_v12 = vadd.f32 %v2303_v10, %v574_v62  ;;  %v3856_v56 = vld [vmem:[%s6206_s1 + $0x3f8] sm:$0xff]   ;;  %v587_v4 = vld [vmem:[%s6207_s2 + $0x4b0] sm:$0xff] }
 0x19f   : > { %2790 = vst.msk [vmem:[%s6208_s3 + $0x58] sm:$0xff] %vm172_vm1, %v1800_v7  ;;  %2918 = vst.msk [vmem:[%s6208_s3 + $0x458] sm:$0xff] %vm172_vm1, %v2312_v8  ;;  %3577 = vmatmul.mubr.msk.bf16.gmra.mrb[116].mxu0 %vm1333_vm3, %v3847_v63  ;;  %3705 = vmatmul.mubr.msk.bf16.gmra.mrb[116].mxu1 %vm1333_vm3, %v3848_v0  ;;  %v460_v9 = vld [vmem:[%s6207_s2 + $0xb8] sm:$0xff] }
 0x1a0   : > { %2788 = vst.msk [vmem:[%s6208_s3 + $0x48] sm:$0xff] %vm172_vm1, %v1792_v11  ;;  %2916 = vst.msk [vmem:[%s6208_s3 + $0x448] sm:$0xff] %vm172_vm1, %v2304_v12  ;;  %3580 = vmatprep.mubr.msk.bf16.mxu0 %vm1333_vm3, %v3849_v5  ;;  %3708 = vmatprep.mubr.msk.bf16.mxu1 %vm1333_vm3, %v3850_v6  ;;  %v457_v5 = vld [vmem:[%s6207_s2 + $0xa0] sm:$0xff]  ;;  %v588_v10 = vld [vmem:[%s6207_s2 + $0x4b8] sm:$0xff] }
 0x1a1   : > { %v585_v6 = vld [vmem:[%s6207_s2 + $0x4a0] sm:$0xff] }
 0x1a2   : > { %v3474_v17 = vpop.f32.mrb[12].mxu0  ;;  %v3602_v18 = vpop.f32.mrb[12].mxu1 }
 0x1a3   : > { %v1813_v22 = vadd.f32 %v3474_v17, %v451_v13  ;;  %v2325_v23 = vadd.f32 %v3602_v18, %v579_v14  ;;  %v1804_v24 = vpop.f32.mrb[13].mxu0  ;;  %v2316_v25 = vpop.f32.mrb[13].mxu1 }
 0x1a4   : > { %v1805_v29 = vadd.f32 %v1804_v24, %v449_v15  ;;  %v2317_v30 = vadd.f32 %v2316_v25, %v577_v16  ;;  %v3475_v31 = vpop.f32.mrb[14].mxu0  ;;  %v3603_v32 = vpop.f32.mrb[14].mxu1  ;;  %v458_v15 = vld [vmem:[%s6207_s2 + $0xa8] sm:$0xff] }
 0x1a5   : > { %2793 = vst.msk [vmem:[%s6208_s3 + $0x70] sm:$0xff] %vm172_vm1, %v1813_v22  ;;  %2921 = vst.msk [vmem:[%s6208_s3 + $0x470] sm:$0xff] %vm172_vm1, %v2325_v23  ;;  %v1816_v35 = vadd.f32 %v3475_v31, %v452_v19  ;;  %v2328_v36 = vadd.f32 %v3603_v32, %v580_v20  ;;  %v1807_v37 = vpop.f32.mrb[15].mxu0  ;;  %v2319_v38 = vpop.f32.mrb[15].mxu1  ;;  %v586_v16 = vld [vmem:[%s6207_s2 + $0x4a8] sm:$0xff] }
 0x1a6   : > { %2791 = vst.msk [vmem:[%s6208_s3 + $0x60] sm:$0xff] %vm172_vm1, %v1805_v29  ;;  %2919 = vst.msk [vmem:[%s6208_s3 + $0x460] sm:$0xff] %vm172_vm1, %v2317_v30  ;;  %v1808_v39 = vadd.f32 %v1807_v37, %v450_v21  ;;  %v2320_v40 = vadd.f32 %v2319_v38, %v578_v26  ;;  %v461_v29 = vld [vmem:[%s6207_s2 + $0xc0] sm:$0xff] }
 0x1a7   : > { %2794 = vst.msk [vmem:[%s6208_s3 + $0x78] sm:$0xff] %vm172_vm1, %v1816_v35  ;;  %2922 = vst.msk [vmem:[%s6208_s3 + $0x478] sm:$0xff] %vm172_vm1, %v2328_v36  ;;  %3581 = vmatmul.mubr.msk.bf16.gmra.mrb[120].mxu0 %vm1333_vm3, %v3851_v27  ;;  %3709 = vmatmul.mubr.msk.bf16.gmra.mrb[120].mxu1 %vm1333_vm3, %v3852_v28  ;;  %v463_v27 = vld [vmem:[%s6207_s2 + $0xd0] sm:$0xff]  ;;  %v589_v30 = vld [vmem:[%s6207_s2 + $0x4c0] sm:$0xff] }
 0x1a8   : > { %2792 = vst.msk [vmem:[%s6208_s3 + $0x68] sm:$0xff] %vm172_vm1, %v1808_v39  ;;  %2920 = vst.msk [vmem:[%s6208_s3 + $0x468] sm:$0xff] %vm172_vm1, %v2320_v40  ;;  %3584 = vmatprep.mubr.msk.bf16.mxu0 %vm1333_vm3, %v3853_v33  ;;  %3712 = vmatprep.mubr.msk.bf16.mxu1 %vm1333_vm3, %v3854_v34  ;;  %v591_v28 = vld [vmem:[%s6207_s2 + $0x4d0] sm:$0xff]  ;;  %v464_v33 = vld [vmem:[%s6207_s2 + $0xd8] sm:$0xff] }
 0x1a9   : > { %v592_v34 = vld [vmem:[%s6207_s2 + $0x4d8] sm:$0xff]  ;;  %v462_v39 = vld [vmem:[%s6207_s2 + $0xc8] sm:$0xff] }
 0x1aa   : > { %v3478_v45 = vpop.f32.mrb[16].mxu0  ;;  %v3606_v46 = vpop.f32.mrb[16].mxu1  ;;  %v590_v40 = vld [vmem:[%s6207_s2 + $0x4c8] sm:$0xff] }
 0x1ab   : > { %v1829_v50 = vadd.f32 %v3478_v45, %v455_v41  ;;  %v2341_v51 = vadd.f32 %v3606_v46, %v583_v42  ;;  %v1820_v52 = vpop.f32.mrb[17].mxu0  ;;  %v2332_v53 = vpop.f32.mrb[17].mxu1 }
 0x1ac   : > { %v1821_v57 = vadd.f32 %v1820_v52, %v453_v43  ;;  %v2333_v58 = vadd.f32 %v2332_v53, %v581_v44  ;;  %v3479_v59 = vpop.f32.mrb[18].mxu0  ;;  %v3607_v60 = vpop.f32.mrb[18].mxu1  ;;  %v595_v52 = vld [vmem:[%s6207_s2 + $0x4f0] sm:$0xff]  ;;  %v465_v53 = vld [vmem:[%s6207_s2 + $0xe0] sm:$0xff] }
 0x1ad   : > { %2797 = vst.msk [vmem:[%s6208_s3 + $0x90] sm:$0xff] %vm172_vm1, %v1829_v50  ;;  %2925 = vst.msk [vmem:[%s6208_s3 + $0x490] sm:$0xff] %vm172_vm1, %v2341_v51  ;;  %v1832_v61 = vadd.f32 %v3479_v59, %v456_v47  ;;  %v2344_v62 = vadd.f32 %v3607_v60, %v584_v48  ;;  %v1823_v63 = vpop.f32.mrb[19].mxu0  ;;  %v2335_v0 = vpop.f32.mrb[19].mxu1  ;;  %v467_v51 = vld [vmem:[%s6207_s2 + $0xf0] sm:$0xff] }
 0x1ae   : > { %2795 = vst.msk [vmem:[%s6208_s3 + $0x80] sm:$0xff] %vm172_vm1, %v1821_v57  ;;  %2923 = vst.msk [vmem:[%s6208_s3 + $0x480] sm:$0xff] %vm172_vm1, %v2333_v58  ;;  %v1824_v1 = vadd.f32 %v1823_v63, %v454_v49  ;;  %v2336_v2 = vadd.f32 %v2335_v0, %v582_v54  ;;  %v593_v54 = vld [vmem:[%s6207_s2 + $0x4e0] sm:$0xff]  ;;  %v468_v57 = vld [vmem:[%s6207_s2 + $0xf8] sm:$0xff] }
 0x1af   : > { %2798 = vst.msk [vmem:[%s6208_s3 + $0x98] sm:$0xff] %vm172_vm1, %v1832_v61  ;;  %2926 = vst.msk [vmem:[%s6208_s3 + $0x498] sm:$0xff] %vm172_vm1, %v2344_v62  ;;  %3585 = vmatmul.mubr.msk.bf16.gmra.mrb[124].mxu0 %vm1333_vm3, %v3855_v55  ;;  %3713 = vmatmul.mubr.msk.bf16.gmra.mrb[124].mxu1 %vm1333_vm3, %v3856_v56  ;;  %v596_v58 = vld [vmem:[%s6207_s2 + $0x4f8] sm:$0xff]  ;;  %v466_v63 = vld [vmem:[%s6207_s2 + $0xe8] sm:$0xff] }
 0x1b0   : > { %2796 = vst.msk [vmem:[%s6208_s3 + $0x88] sm:$0xff] %vm172_vm1, %v1824_v1  ;;  %2924 = vst.msk [vmem:[%s6208_s3 + $0x488] sm:$0xff] %vm172_vm1, %v2336_v2  ;;  %v594_v0 = vld [vmem:[%s6207_s2 + $0x4e8] sm:$0xff] }
 0x1b2   : > { %v3482_v7 = vpop.f32.mrb[20].mxu0  ;;  %v3610_v8 = vpop.f32.mrb[20].mxu1 }
 0x1b3   : > { %v1845_v11 = vadd.f32 %v3482_v7, %v459_v3  ;;  %v2357_v12 = vadd.f32 %v3610_v8, %v587_v4  ;;  %v1836_v13 = vpop.f32.mrb[21].mxu0  ;;  %v2348_v14 = vpop.f32.mrb[21].mxu1 }
 0x1b4   : > { %v1837_v17 = vadd.f32 %v1836_v13, %v457_v5  ;;  %v2349_v18 = vadd.f32 %v2348_v14, %v585_v6  ;;  %v3483_v19 = vpop.f32.mrb[22].mxu0  ;;  %v3611_v20 = vpop.f32.mrb[22].mxu1  ;;  %v469_v13 = vld [vmem:[%s6207_s2 + $0x100] sm:$0xff] }
 0x1b5   : > { %2801 = vst.msk [vmem:[%s6208_s3 + $0xb0] sm:$0xff] %vm172_vm1, %v1845_v11  ;;  %2929 = vst.msk [vmem:[%s6208_s3 + $0x4b0] sm:$0xff] %vm172_vm1, %v2357_v12  ;;  %v1848_v21 = vadd.f32 %v3483_v19, %v460_v9  ;;  %v2360_v22 = vadd.f32 %v3611_v20, %v588_v10  ;;  %v1839_v23 = vpop.f32.mrb[23].mxu0  ;;  %v2351_v24 = vpop.f32.mrb[23].mxu1  ;;  %v471_v11 = vld [vmem:[%s6207_s2 + $0x110] sm:$0xff]  ;;  %v597_v14 = vld [vmem:[%s6207_s2 + $0x500] sm:$0xff] }
 0x1b6   : > { %2799 = vst.msk [vmem:[%s6208_s3 + $0xa0] sm:$0xff] %vm172_vm1, %v1837_v17  ;;  %2927 = vst.msk [vmem:[%s6208_s3 + $0x4a0] sm:$0xff] %vm172_vm1, %v2349_v18  ;;  %v1840_v25 = vadd.f32 %v1839_v23, %v458_v15  ;;  %v2352_v26 = vadd.f32 %v2351_v24, %v586_v16  ;;  %v599_v12 = vld [vmem:[%s6207_s2 + $0x510] sm:$0xff]  ;;  %v472_v17 = vld [vmem:[%s6207_s2 + $0x118] sm:$0xff] }
 0x1b7   : > { %2802 = vst.msk [vmem:[%s6208_s3 + $0xb8] sm:$0xff] %vm172_vm1, %v1848_v21  ;;  %2930 = vst.msk [vmem:[%s6208_s3 + $0x4b8] sm:$0xff] %vm172_vm1, %v2360_v22  ;;  %v600_v18 = vld [vmem:[%s6207_s2 + $0x518] sm:$0xff]  ;;  %v470_v23 = vld [vmem:[%s6207_s2 + $0x108] sm:$0xff] }
 0x1b8   : > { %2800 = vst.msk [vmem:[%s6208_s3 + $0xa8] sm:$0xff] %vm172_vm1, %v1840_v25  ;;  %2928 = vst.msk [vmem:[%s6208_s3 + $0x4a8] sm:$0xff] %vm172_vm1, %v2352_v26  ;;  %v598_v24 = vld [vmem:[%s6207_s2 + $0x508] sm:$0xff] }
 0x1ba   : > { %v3486_v31 = vpop.f32.mrb[24].mxu0  ;;  %v3614_v32 = vpop.f32.mrb[24].mxu1 }
 0x1bb   : > { %v1861_v35 = vadd.f32 %v3486_v31, %v463_v27  ;;  %v2373_v36 = vadd.f32 %v3614_v32, %v591_v28  ;;  %v1852_v37 = vpop.f32.mrb[25].mxu0  ;;  %v2364_v38 = vpop.f32.mrb[25].mxu1 }
 0x1bc   : > { %v1853_v41 = vadd.f32 %v1852_v37, %v461_v29  ;;  %v2365_v42 = vadd.f32 %v2364_v38, %v589_v30  ;;  %v3487_v43 = vpop.f32.mrb[26].mxu0  ;;  %v3615_v44 = vpop.f32.mrb[26].mxu1  ;;  %v473_v37 = vld [vmem:[%s6207_s2 + $0x120] sm:$0xff] }
 0x1bd   : > { %2805 = vst.msk [vmem:[%s6208_s3 + $0xd0] sm:$0xff] %vm172_vm1, %v1861_v35  ;;  %2933 = vst.msk [vmem:[%s6208_s3 + $0x4d0] sm:$0xff] %vm172_vm1, %v2373_v36  ;;  %v1864_v45 = vadd.f32 %v3487_v43, %v464_v33  ;;  %v2376_v46 = vadd.f32 %v3615_v44, %v592_v34  ;;  %v1855_v47 = vpop.f32.mrb[27].mxu0  ;;  %v2367_v48 = vpop.f32.mrb[27].mxu1  ;;  %v475_v35 = vld [vmem:[%s6207_s2 + $0x130] sm:$0xff]  ;;  %v601_v38 = vld [vmem:[%s6207_s2 + $0x520] sm:$0xff] }
 0x1be   : > { %2803 = vst.msk [vmem:[%s6208_s3 + $0xc0] sm:$0xff] %vm172_vm1, %v1853_v41  ;;  %2931 = vst.msk [vmem:[%s6208_s3 + $0x4c0] sm:$0xff] %vm172_vm1, %v2365_v42  ;;  %v1856_v49 = vadd.f32 %v1855_v47, %v462_v39  ;;  %v2368_v50 = vadd.f32 %v2367_v48, %v590_v40  ;;  %v603_v36 = vld [vmem:[%s6207_s2 + $0x530] sm:$0xff]  ;;  %v476_v41 = vld [vmem:[%s6207_s2 + $0x138] sm:$0xff] }
 0x1bf   : > { %2806 = vst.msk [vmem:[%s6208_s3 + $0xd8] sm:$0xff] %vm172_vm1, %v1864_v45  ;;  %2934 = vst.msk [vmem:[%s6208_s3 + $0x4d8] sm:$0xff] %vm172_vm1, %v2376_v46  ;;  %v604_v42 = vld [vmem:[%s6207_s2 + $0x538] sm:$0xff]  ;;  %v474_v47 = vld [vmem:[%s6207_s2 + $0x128] sm:$0xff] }
 0x1c0   : > { %2804 = vst.msk [vmem:[%s6208_s3 + $0xc8] sm:$0xff] %vm172_vm1, %v1856_v49  ;;  %2932 = vst.msk [vmem:[%s6208_s3 + $0x4c8] sm:$0xff] %vm172_vm1, %v2368_v50  ;;  %v602_v48 = vld [vmem:[%s6207_s2 + $0x528] sm:$0xff] }
 0x1c2   : > { %v3490_v55 = vpop.f32.mrb[28].mxu0  ;;  %v3618_v56 = vpop.f32.mrb[28].mxu1 }
 0x1c3   : > { %v1877_v59 = vadd.f32 %v3490_v55, %v467_v51  ;;  %v2389_v60 = vadd.f32 %v3618_v56, %v595_v52  ;;  %v1868_v61 = vpop.f32.mrb[29].mxu0  ;;  %v2380_v62 = vpop.f32.mrb[29].mxu1 }
 0x1c4   : > { %v1869_v1 = vadd.f32 %v1868_v61, %v465_v53  ;;  %v2381_v2 = vadd.f32 %v2380_v62, %v593_v54  ;;  %v3491_v3 = vpop.f32.mrb[30].mxu0  ;;  %v3619_v4 = vpop.f32.mrb[30].mxu1  ;;  %v477_v61 = vld [vmem:[%s6207_s2 + $0x140] sm:$0xff] }
 0x1c5   : > { %2809 = vst.msk [vmem:[%s6208_s3 + $0xf0] sm:$0xff] %vm172_vm1, %v1877_v59  ;;  %2937 = vst.msk [vmem:[%s6208_s3 + $0x4f0] sm:$0xff] %vm172_vm1, %v2389_v60  ;;  %v1880_v5 = vadd.f32 %v3491_v3, %v468_v57  ;;  %v2392_v6 = vadd.f32 %v3619_v4, %v596_v58  ;;  %v1871_v7 = vpop.f32.mrb[31].mxu0  ;;  %v2383_v8 = vpop.f32.mrb[31].mxu1  ;;  %v479_v59 = vld [vmem:[%s6207_s2 + $0x150] sm:$0xff]  ;;  %v605_v62 = vld [vmem:[%s6207_s2 + $0x540] sm:$0xff] }
 0x1c6   : > { %2807 = vst.msk [vmem:[%s6208_s3 + $0xe0] sm:$0xff] %vm172_vm1, %v1869_v1  ;;  %2935 = vst.msk [vmem:[%s6208_s3 + $0x4e0] sm:$0xff] %vm172_vm1, %v2381_v2  ;;  %v1872_v9 = vadd.f32 %v1871_v7, %v466_v63  ;;  %v2384_v10 = vadd.f32 %v2383_v8, %v594_v0  ;;  %v607_v60 = vld [vmem:[%s6207_s2 + $0x550] sm:$0xff]  ;;  %v480_v1 = vld [vmem:[%s6207_s2 + $0x158] sm:$0xff] }
 0x1c7   : > { %2810 = vst.msk [vmem:[%s6208_s3 + $0xf8] sm:$0xff] %vm172_vm1, %v1880_v5  ;;  %2938 = vst.msk [vmem:[%s6208_s3 + $0x4f8] sm:$0xff] %vm172_vm1, %v2392_v6  ;;  %v608_v2 = vld [vmem:[%s6207_s2 + $0x558] sm:$0xff]  ;;  %v478_v7 = vld [vmem:[%s6207_s2 + $0x148] sm:$0xff] }
 0x1c8   : > { %2808 = vst.msk [vmem:[%s6208_s3 + $0xe8] sm:$0xff] %vm172_vm1, %v1872_v9  ;;  %2936 = vst.msk [vmem:[%s6208_s3 + $0x4e8] sm:$0xff] %vm172_vm1, %v2384_v10  ;;  %v606_v8 = vld [vmem:[%s6207_s2 + $0x548] sm:$0xff] }
 0x1ca   : > { %v3494_v15 = vpop.f32.mrb[32].mxu0  ;;  %v3622_v16 = vpop.f32.mrb[32].mxu1 }
 0x1cb   : > { %v1893_v19 = vadd.f32 %v3494_v15, %v471_v11  ;;  %v2405_v20 = vadd.f32 %v3622_v16, %v599_v12  ;;  %v1884_v21 = vpop.f32.mrb[33].mxu0  ;;  %v2396_v22 = vpop.f32.mrb[33].mxu1 }
 0x1cc   : > { %v1885_v25 = vadd.f32 %v1884_v21, %v469_v13  ;;  %v2397_v26 = vadd.f32 %v2396_v22, %v597_v14  ;;  %v3495_v27 = vpop.f32.mrb[34].mxu0  ;;  %v3623_v28 = vpop.f32.mrb[34].mxu1  ;;  %v481_v21 = vld [vmem:[%s6207_s2 + $0x160] sm:$0xff] }
 0x1cd   : > { %2813 = vst.msk [vmem:[%s6208_s3 + $0x110] sm:$0xff] %vm172_vm1, %v1893_v19  ;;  %2941 = vst.msk [vmem:[%s6208_s3 + $0x510] sm:$0xff] %vm172_vm1, %v2405_v20  ;;  %v1896_v29 = vadd.f32 %v3495_v27, %v472_v17  ;;  %v2408_v30 = vadd.f32 %v3623_v28, %v600_v18  ;;  %v1887_v31 = vpop.f32.mrb[35].mxu0  ;;  %v2399_v32 = vpop.f32.mrb[35].mxu1  ;;  %v483_v19 = vld [vmem:[%s6207_s2 + $0x170] sm:$0xff]  ;;  %v609_v22 = vld [vmem:[%s6207_s2 + $0x560] sm:$0xff] }
 0x1ce   : > { %2811 = vst.msk [vmem:[%s6208_s3 + $0x100] sm:$0xff] %vm172_vm1, %v1885_v25  ;;  %2939 = vst.msk [vmem:[%s6208_s3 + $0x500] sm:$0xff] %vm172_vm1, %v2397_v26  ;;  %v1888_v33 = vadd.f32 %v1887_v31, %v470_v23  ;;  %v2400_v34 = vadd.f32 %v2399_v32, %v598_v24  ;;  %v611_v20 = vld [vmem:[%s6207_s2 + $0x570] sm:$0xff]  ;;  %v484_v25 = vld [vmem:[%s6207_s2 + $0x178] sm:$0xff] }
 0x1cf   : > { %2814 = vst.msk [vmem:[%s6208_s3 + $0x118] sm:$0xff] %vm172_vm1, %v1896_v29  ;;  %2942 = vst.msk [vmem:[%s6208_s3 + $0x518] sm:$0xff] %vm172_vm1, %v2408_v30  ;;  %v612_v26 = vld [vmem:[%s6207_s2 + $0x578] sm:$0xff]  ;;  %v482_v31 = vld [vmem:[%s6207_s2 + $0x168] sm:$0xff] }
 0x1d0   : > { %2812 = vst.msk [vmem:[%s6208_s3 + $0x108] sm:$0xff] %vm172_vm1, %v1888_v33  ;;  %2940 = vst.msk [vmem:[%s6208_s3 + $0x508] sm:$0xff] %vm172_vm1, %v2400_v34  ;;  %v610_v32 = vld [vmem:[%s6207_s2 + $0x568] sm:$0xff] }
 0x1d2   : > { %v3498_v39 = vpop.f32.mrb[36].mxu0  ;;  %v3626_v40 = vpop.f32.mrb[36].mxu1 }
 0x1d3   : > { %v1909_v43 = vadd.f32 %v3498_v39, %v475_v35  ;;  %v2421_v44 = vadd.f32 %v3626_v40, %v603_v36  ;;  %v1900_v45 = vpop.f32.mrb[37].mxu0  ;;  %v2412_v46 = vpop.f32.mrb[37].mxu1 }
 0x1d4   : > { %v1901_v49 = vadd.f32 %v1900_v45, %v473_v37  ;;  %v2413_v50 = vadd.f32 %v2412_v46, %v601_v38  ;;  %v3499_v51 = vpop.f32.mrb[38].mxu0  ;;  %v3627_v52 = vpop.f32.mrb[38].mxu1  ;;  %v485_v45 = vld [vmem:[%s6207_s2 + $0x180] sm:$0xff] }
 0x1d5   : > { %2817 = vst.msk [vmem:[%s6208_s3 + $0x130] sm:$0xff] %vm172_vm1, %v1909_v43  ;;  %2945 = vst.msk [vmem:[%s6208_s3 + $0x530] sm:$0xff] %vm172_vm1, %v2421_v44  ;;  %v1912_v53 = vadd.f32 %v3499_v51, %v476_v41  ;;  %v2424_v54 = vadd.f32 %v3627_v52, %v604_v42  ;;  %v1903_v55 = vpop.f32.mrb[39].mxu0  ;;  %v2415_v56 = vpop.f32.mrb[39].mxu1  ;;  %v487_v43 = vld [vmem:[%s6207_s2 + $0x190] sm:$0xff]  ;;  %v613_v46 = vld [vmem:[%s6207_s2 + $0x580] sm:$0xff] }
 0x1d6   : > { %2815 = vst.msk [vmem:[%s6208_s3 + $0x120] sm:$0xff] %vm172_vm1, %v1901_v49  ;;  %2943 = vst.msk [vmem:[%s6208_s3 + $0x520] sm:$0xff] %vm172_vm1, %v2413_v50  ;;  %v1904_v57 = vadd.f32 %v1903_v55, %v474_v47  ;;  %v2416_v58 = vadd.f32 %v2415_v56, %v602_v48  ;;  %v615_v44 = vld [vmem:[%s6207_s2 + $0x590] sm:$0xff]  ;;  %v488_v49 = vld [vmem:[%s6207_s2 + $0x198] sm:$0xff] }
 0x1d7   : > { %2818 = vst.msk [vmem:[%s6208_s3 + $0x138] sm:$0xff] %vm172_vm1, %v1912_v53  ;;  %2946 = vst.msk [vmem:[%s6208_s3 + $0x538] sm:$0xff] %vm172_vm1, %v2424_v54  ;;  %v616_v50 = vld [vmem:[%s6207_s2 + $0x598] sm:$0xff]  ;;  %v486_v55 = vld [vmem:[%s6207_s2 + $0x188] sm:$0xff] }
 0x1d8   : > { %2816 = vst.msk [vmem:[%s6208_s3 + $0x128] sm:$0xff] %vm172_vm1, %v1904_v57  ;;  %2944 = vst.msk [vmem:[%s6208_s3 + $0x528] sm:$0xff] %vm172_vm1, %v2416_v58  ;;  %v614_v56 = vld [vmem:[%s6207_s2 + $0x588] sm:$0xff] }
 0x1da   : > { %v3502_v63 = vpop.f32.mrb[40].mxu0  ;;  %v3630_v0 = vpop.f32.mrb[40].mxu1 }
 0x1db   : > { %v1925_v3 = vadd.f32 %v3502_v63, %v479_v59  ;;  %v2437_v4 = vadd.f32 %v3630_v0, %v607_v60  ;;  %v1916_v5 = vpop.f32.mrb[41].mxu0  ;;  %v2428_v6 = vpop.f32.mrb[41].mxu1 }
 0x1dc   : > { %v1917_v9 = vadd.f32 %v1916_v5, %v477_v61  ;;  %v2429_v10 = vadd.f32 %v2428_v6, %v605_v62  ;;  %v3503_v11 = vpop.f32.mrb[42].mxu0  ;;  %v3631_v12 = vpop.f32.mrb[42].mxu1  ;;  %v489_v5 = vld [vmem:[%s6207_s2 + $0x1a0] sm:$0xff] }
 0x1dd   : > { %2821 = vst.msk [vmem:[%s6208_s3 + $0x150] sm:$0xff] %vm172_vm1, %v1925_v3  ;;  %2949 = vst.msk [vmem:[%s6208_s3 + $0x550] sm:$0xff] %vm172_vm1, %v2437_v4  ;;  %v1928_v13 = vadd.f32 %v3503_v11, %v480_v1  ;;  %v2440_v14 = vadd.f32 %v3631_v12, %v608_v2  ;;  %v1919_v15 = vpop.f32.mrb[43].mxu0  ;;  %v2431_v16 = vpop.f32.mrb[43].mxu1  ;;  %v491_v3 = vld [vmem:[%s6207_s2 + $0x1b0] sm:$0xff]  ;;  %v617_v6 = vld [vmem:[%s6207_s2 + $0x5a0] sm:$0xff] }
 0x1de   : > { %2819 = vst.msk [vmem:[%s6208_s3 + $0x140] sm:$0xff] %vm172_vm1, %v1917_v9  ;;  %2947 = vst.msk [vmem:[%s6208_s3 + $0x540] sm:$0xff] %vm172_vm1, %v2429_v10  ;;  %v1920_v17 = vadd.f32 %v1919_v15, %v478_v7  ;;  %v2432_v18 = vadd.f32 %v2431_v16, %v606_v8  ;;  %v619_v4 = vld [vmem:[%s6207_s2 + $0x5b0] sm:$0xff]  ;;  %v492_v9 = vld [vmem:[%s6207_s2 + $0x1b8] sm:$0xff] }
 0x1df   : > { %2822 = vst.msk [vmem:[%s6208_s3 + $0x158] sm:$0xff] %vm172_vm1, %v1928_v13  ;;  %2950 = vst.msk [vmem:[%s6208_s3 + $0x558] sm:$0xff] %vm172_vm1, %v2440_v14  ;;  %v620_v10 = vld [vmem:[%s6207_s2 + $0x5b8] sm:$0xff]  ;;  %v490_v15 = vld [vmem:[%s6207_s2 + $0x1a8] sm:$0xff] }
 0x1e0   : > { %2820 = vst.msk [vmem:[%s6208_s3 + $0x148] sm:$0xff] %vm172_vm1, %v1920_v17  ;;  %2948 = vst.msk [vmem:[%s6208_s3 + $0x548] sm:$0xff] %vm172_vm1, %v2432_v18  ;;  %v618_v16 = vld [vmem:[%s6207_s2 + $0x5a8] sm:$0xff] }
 0x1e2   : > { %v3506_v23 = vpop.f32.mrb[44].mxu0  ;;  %v3634_v24 = vpop.f32.mrb[44].mxu1 }
 0x1e3   : > { %v1941_v27 = vadd.f32 %v3506_v23, %v483_v19  ;;  %v2453_v28 = vadd.f32 %v3634_v24, %v611_v20  ;;  %v1932_v29 = vpop.f32.mrb[45].mxu0  ;;  %v2444_v30 = vpop.f32.mrb[45].mxu1 }
 0x1e4   : > { %v1933_v33 = vadd.f32 %v1932_v29, %v481_v21  ;;  %v2445_v34 = vadd.f32 %v2444_v30, %v609_v22  ;;  %v3507_v35 = vpop.f32.mrb[46].mxu0  ;;  %v3635_v36 = vpop.f32.mrb[46].mxu1  ;;  %v493_v29 = vld [vmem:[%s6207_s2 + $0x1c0] sm:$0xff] }
 0x1e5   : > { %2825 = vst.msk [vmem:[%s6208_s3 + $0x170] sm:$0xff] %vm172_vm1, %v1941_v27  ;;  %2953 = vst.msk [vmem:[%s6208_s3 + $0x570] sm:$0xff] %vm172_vm1, %v2453_v28  ;;  %v1944_v37 = vadd.f32 %v3507_v35, %v484_v25  ;;  %v2456_v38 = vadd.f32 %v3635_v36, %v612_v26  ;;  %v1935_v39 = vpop.f32.mrb[47].mxu0  ;;  %v2447_v40 = vpop.f32.mrb[47].mxu1  ;;  %v495_v27 = vld [vmem:[%s6207_s2 + $0x1d0] sm:$0xff]  ;;  %v621_v30 = vld [vmem:[%s6207_s2 + $0x5c0] sm:$0xff] }
 0x1e6   : > { %2823 = vst.msk [vmem:[%s6208_s3 + $0x160] sm:$0xff] %vm172_vm1, %v1933_v33  ;;  %2951 = vst.msk [vmem:[%s6208_s3 + $0x560] sm:$0xff] %vm172_vm1, %v2445_v34  ;;  %v1936_v41 = vadd.f32 %v1935_v39, %v482_v31  ;;  %v2448_v42 = vadd.f32 %v2447_v40, %v610_v32  ;;  %v623_v28 = vld [vmem:[%s6207_s2 + $0x5d0] sm:$0xff]  ;;  %v496_v33 = vld [vmem:[%s6207_s2 + $0x1d8] sm:$0xff] }
 0x1e7   : > { %2826 = vst.msk [vmem:[%s6208_s3 + $0x178] sm:$0xff] %vm172_vm1, %v1944_v37  ;;  %2954 = vst.msk [vmem:[%s6208_s3 + $0x578] sm:$0xff] %vm172_vm1, %v2456_v38  ;;  %v624_v34 = vld [vmem:[%s6207_s2 + $0x5d8] sm:$0xff]  ;;  %v494_v39 = vld [vmem:[%s6207_s2 + $0x1c8] sm:$0xff] }
 0x1e8   : > { %2824 = vst.msk [vmem:[%s6208_s3 + $0x168] sm:$0xff] %vm172_vm1, %v1936_v41  ;;  %2952 = vst.msk [vmem:[%s6208_s3 + $0x568] sm:$0xff] %vm172_vm1, %v2448_v42  ;;  %v622_v40 = vld [vmem:[%s6207_s2 + $0x5c8] sm:$0xff] }
 0x1ea   : > { %v3510_v47 = vpop.f32.mrb[48].mxu0  ;;  %v3638_v48 = vpop.f32.mrb[48].mxu1 }
 0x1eb   : > { %v1957_v51 = vadd.f32 %v3510_v47, %v487_v43  ;;  %v2469_v52 = vadd.f32 %v3638_v48, %v615_v44  ;;  %v1948_v53 = vpop.f32.mrb[49].mxu0  ;;  %v2460_v54 = vpop.f32.mrb[49].mxu1 }
 0x1ec   : > { %v1949_v57 = vadd.f32 %v1948_v53, %v485_v45  ;;  %v2461_v58 = vadd.f32 %v2460_v54, %v613_v46  ;;  %v3511_v59 = vpop.f32.mrb[50].mxu0  ;;  %v3639_v60 = vpop.f32.mrb[50].mxu1  ;;  %v497_v53 = vld [vmem:[%s6207_s2 + $0x1e0] sm:$0xff] }
 0x1ed   : > { %2829 = vst.msk [vmem:[%s6208_s3 + $0x190] sm:$0xff] %vm172_vm1, %v1957_v51  ;;  %2957 = vst.msk [vmem:[%s6208_s3 + $0x590] sm:$0xff] %vm172_vm1, %v2469_v52  ;;  %v1960_v61 = vadd.f32 %v3511_v59, %v488_v49  ;;  %v2472_v62 = vadd.f32 %v3639_v60, %v616_v50  ;;  %v1951_v63 = vpop.f32.mrb[51].mxu0  ;;  %v2463_v0 = vpop.f32.mrb[51].mxu1  ;;  %v499_v51 = vld [vmem:[%s6207_s2 + $0x1f0] sm:$0xff]  ;;  %v625_v54 = vld [vmem:[%s6207_s2 + $0x5e0] sm:$0xff] }
 0x1ee   : > { %2827 = vst.msk [vmem:[%s6208_s3 + $0x180] sm:$0xff] %vm172_vm1, %v1949_v57  ;;  %2955 = vst.msk [vmem:[%s6208_s3 + $0x580] sm:$0xff] %vm172_vm1, %v2461_v58  ;;  %v1952_v1 = vadd.f32 %v1951_v63, %v486_v55  ;;  %v2464_v2 = vadd.f32 %v2463_v0, %v614_v56  ;;  %v627_v52 = vld [vmem:[%s6207_s2 + $0x5f0] sm:$0xff]  ;;  %v500_v57 = vld [vmem:[%s6207_s2 + $0x1f8] sm:$0xff] }
 0x1ef   : > { %2830 = vst.msk [vmem:[%s6208_s3 + $0x198] sm:$0xff] %vm172_vm1, %v1960_v61  ;;  %2958 = vst.msk [vmem:[%s6208_s3 + $0x598] sm:$0xff] %vm172_vm1, %v2472_v62  ;;  %v628_v58 = vld [vmem:[%s6207_s2 + $0x5f8] sm:$0xff]  ;;  %v498_v63 = vld [vmem:[%s6207_s2 + $0x1e8] sm:$0xff] }
 0x1f0   : > { %2828 = vst.msk [vmem:[%s6208_s3 + $0x188] sm:$0xff] %vm172_vm1, %v1952_v1  ;;  %2956 = vst.msk [vmem:[%s6208_s3 + $0x588] sm:$0xff] %vm172_vm1, %v2464_v2  ;;  %v626_v0 = vld [vmem:[%s6207_s2 + $0x5e8] sm:$0xff] }
 0x1f2   : > { %v3514_v7 = vpop.f32.mrb[52].mxu0  ;;  %v3642_v8 = vpop.f32.mrb[52].mxu1 }
 0x1f3   : > { %v1973_v11 = vadd.f32 %v3514_v7, %v491_v3  ;;  %v2485_v12 = vadd.f32 %v3642_v8, %v619_v4  ;;  %v1964_v13 = vpop.f32.mrb[53].mxu0  ;;  %v2476_v14 = vpop.f32.mrb[53].mxu1 }
 0x1f4   : > { %v1965_v17 = vadd.f32 %v1964_v13, %v489_v5  ;;  %v2477_v18 = vadd.f32 %v2476_v14, %v617_v6  ;;  %v3515_v19 = vpop.f32.mrb[54].mxu0  ;;  %v3643_v20 = vpop.f32.mrb[54].mxu1  ;;  %v501_v13 = vld [vmem:[%s6207_s2 + $0x200] sm:$0xff] }
 0x1f5   : > { %2833 = vst.msk [vmem:[%s6208_s3 + $0x1b0] sm:$0xff] %vm172_vm1, %v1973_v11  ;;  %2961 = vst.msk [vmem:[%s6208_s3 + $0x5b0] sm:$0xff] %vm172_vm1, %v2485_v12  ;;  %v1976_v21 = vadd.f32 %v3515_v19, %v492_v9  ;;  %v2488_v22 = vadd.f32 %v3643_v20, %v620_v10  ;;  %v1967_v23 = vpop.f32.mrb[55].mxu0  ;;  %v2479_v24 = vpop.f32.mrb[55].mxu1  ;;  %v503_v11 = vld [vmem:[%s6207_s2 + $0x210] sm:$0xff]  ;;  %v629_v14 = vld [vmem:[%s6207_s2 + $0x600] sm:$0xff] }
 0x1f6   : > { %2831 = vst.msk [vmem:[%s6208_s3 + $0x1a0] sm:$0xff] %vm172_vm1, %v1965_v17  ;;  %2959 = vst.msk [vmem:[%s6208_s3 + $0x5a0] sm:$0xff] %vm172_vm1, %v2477_v18  ;;  %v1968_v25 = vadd.f32 %v1967_v23, %v490_v15  ;;  %v2480_v26 = vadd.f32 %v2479_v24, %v618_v16  ;;  %v631_v12 = vld [vmem:[%s6207_s2 + $0x610] sm:$0xff]  ;;  %v504_v17 = vld [vmem:[%s6207_s2 + $0x218] sm:$0xff] }
 0x1f7   : > { %2834 = vst.msk [vmem:[%s6208_s3 + $0x1b8] sm:$0xff] %vm172_vm1, %v1976_v21  ;;  %2962 = vst.msk [vmem:[%s6208_s3 + $0x5b8] sm:$0xff] %vm172_vm1, %v2488_v22  ;;  %v632_v18 = vld [vmem:[%s6207_s2 + $0x618] sm:$0xff]  ;;  %v502_v23 = vld [vmem:[%s6207_s2 + $0x208] sm:$0xff] }
 0x1f8   : > { %2832 = vst.msk [vmem:[%s6208_s3 + $0x1a8] sm:$0xff] %vm172_vm1, %v1968_v25  ;;  %2960 = vst.msk [vmem:[%s6208_s3 + $0x5a8] sm:$0xff] %vm172_vm1, %v2480_v26  ;;  %v630_v24 = vld [vmem:[%s6207_s2 + $0x608] sm:$0xff] }
 0x1fa   : > { %v3518_v31 = vpop.f32.mrb[56].mxu0  ;;  %v3646_v32 = vpop.f32.mrb[56].mxu1 }
 0x1fb   : > { %v1989_v35 = vadd.f32 %v3518_v31, %v495_v27  ;;  %v2501_v36 = vadd.f32 %v3646_v32, %v623_v28  ;;  %v1980_v37 = vpop.f32.mrb[57].mxu0  ;;  %v2492_v38 = vpop.f32.mrb[57].mxu1 }
 0x1fc   : > { %v1981_v41 = vadd.f32 %v1980_v37, %v493_v29  ;;  %v2493_v42 = vadd.f32 %v2492_v38, %v621_v30  ;;  %v3519_v43 = vpop.f32.mrb[58].mxu0  ;;  %v3647_v44 = vpop.f32.mrb[58].mxu1  ;;  %v505_v37 = vld [vmem:[%s6207_s2 + $0x220] sm:$0xff] }
 0x1fd   : > { %2837 = vst.msk [vmem:[%s6208_s3 + $0x1d0] sm:$0xff] %vm172_vm1, %v1989_v35  ;;  %2965 = vst.msk [vmem:[%s6208_s3 + $0x5d0] sm:$0xff] %vm172_vm1, %v2501_v36  ;;  %v1992_v45 = vadd.f32 %v3519_v43, %v496_v33  ;;  %v2504_v46 = vadd.f32 %v3647_v44, %v624_v34  ;;  %v1983_v47 = vpop.f32.mrb[59].mxu0  ;;  %v2495_v48 = vpop.f32.mrb[59].mxu1  ;;  %v507_v35 = vld [vmem:[%s6207_s2 + $0x230] sm:$0xff]  ;;  %v633_v38 = vld [vmem:[%s6207_s2 + $0x620] sm:$0xff] }
 0x1fe   : > { %2835 = vst.msk [vmem:[%s6208_s3 + $0x1c0] sm:$0xff] %vm172_vm1, %v1981_v41  ;;  %2963 = vst.msk [vmem:[%s6208_s3 + $0x5c0] sm:$0xff] %vm172_vm1, %v2493_v42  ;;  %v1984_v49 = vadd.f32 %v1983_v47, %v494_v39  ;;  %v2496_v50 = vadd.f32 %v2495_v48, %v622_v40  ;;  %v635_v36 = vld [vmem:[%s6207_s2 + $0x630] sm:$0xff]  ;;  %v508_v41 = vld [vmem:[%s6207_s2 + $0x238] sm:$0xff] }
 0x1ff   : > { %2838 = vst.msk [vmem:[%s6208_s3 + $0x1d8] sm:$0xff] %vm172_vm1, %v1992_v45  ;;  %2966 = vst.msk [vmem:[%s6208_s3 + $0x5d8] sm:$0xff] %vm172_vm1, %v2504_v46  ;;  %v636_v42 = vld [vmem:[%s6207_s2 + $0x638] sm:$0xff]  ;;  %v506_v47 = vld [vmem:[%s6207_s2 + $0x228] sm:$0xff] }
 0x200   : > { %2836 = vst.msk [vmem:[%s6208_s3 + $0x1c8] sm:$0xff] %vm172_vm1, %v1984_v49  ;;  %2964 = vst.msk [vmem:[%s6208_s3 + $0x5c8] sm:$0xff] %vm172_vm1, %v2496_v50  ;;  %v634_v48 = vld [vmem:[%s6207_s2 + $0x628] sm:$0xff] }
 0x202   : > { %v3522_v55 = vpop.f32.mrb[60].mxu0  ;;  %v3650_v56 = vpop.f32.mrb[60].mxu1 }
 0x203   : > { %v2005_v59 = vadd.f32 %v3522_v55, %v499_v51  ;;  %v2517_v60 = vadd.f32 %v3650_v56, %v627_v52  ;;  %v1996_v61 = vpop.f32.mrb[61].mxu0  ;;  %v2508_v62 = vpop.f32.mrb[61].mxu1 }
 0x204   : > { %v1997_v1 = vadd.f32 %v1996_v61, %v497_v53  ;;  %v2509_v2 = vadd.f32 %v2508_v62, %v625_v54  ;;  %v3523_v3 = vpop.f32.mrb[62].mxu0  ;;  %v3651_v4 = vpop.f32.mrb[62].mxu1  ;;  %v509_v61 = vld [vmem:[%s6207_s2 + $0x240] sm:$0xff] }
 0x205   : > { %2841 = vst.msk [vmem:[%s6208_s3 + $0x1f0] sm:$0xff] %vm172_vm1, %v2005_v59  ;;  %2969 = vst.msk [vmem:[%s6208_s3 + $0x5f0] sm:$0xff] %vm172_vm1, %v2517_v60  ;;  %v2008_v5 = vadd.f32 %v3523_v3, %v500_v57  ;;  %v2520_v6 = vadd.f32 %v3651_v4, %v628_v58  ;;  %v1999_v7 = vpop.f32.mrb[63].mxu0  ;;  %v2511_v8 = vpop.f32.mrb[63].mxu1  ;;  %v511_v59 = vld [vmem:[%s6207_s2 + $0x250] sm:$0xff]  ;;  %v637_v62 = vld [vmem:[%s6207_s2 + $0x640] sm:$0xff] }
 0x206   : > { %2839 = vst.msk [vmem:[%s6208_s3 + $0x1e0] sm:$0xff] %vm172_vm1, %v1997_v1  ;;  %2967 = vst.msk [vmem:[%s6208_s3 + $0x5e0] sm:$0xff] %vm172_vm1, %v2509_v2  ;;  %v2000_v9 = vadd.f32 %v1999_v7, %v498_v63  ;;  %v2512_v10 = vadd.f32 %v2511_v8, %v626_v0  ;;  %v639_v60 = vld [vmem:[%s6207_s2 + $0x650] sm:$0xff]  ;;  %v512_v1 = vld [vmem:[%s6207_s2 + $0x258] sm:$0xff] }
 0x207   : > { %2842 = vst.msk [vmem:[%s6208_s3 + $0x1f8] sm:$0xff] %vm172_vm1, %v2008_v5  ;;  %2970 = vst.msk [vmem:[%s6208_s3 + $0x5f8] sm:$0xff] %vm172_vm1, %v2520_v6  ;;  %v640_v2 = vld [vmem:[%s6207_s2 + $0x658] sm:$0xff]  ;;  %v510_v7 = vld [vmem:[%s6207_s2 + $0x248] sm:$0xff] }
 0x208   : > { %2840 = vst.msk [vmem:[%s6208_s3 + $0x1e8] sm:$0xff] %vm172_vm1, %v2000_v9  ;;  %2968 = vst.msk [vmem:[%s6208_s3 + $0x5e8] sm:$0xff] %vm172_vm1, %v2512_v10  ;;  %v638_v8 = vld [vmem:[%s6207_s2 + $0x648] sm:$0xff] }
 0x20a   : > { %v3526_v15 = vpop.f32.mrb[64].mxu0  ;;  %v3654_v16 = vpop.f32.mrb[64].mxu1 }
 0x20b   : > { %v2021_v19 = vadd.f32 %v3526_v15, %v503_v11  ;;  %v2533_v20 = vadd.f32 %v3654_v16, %v631_v12  ;;  %v2012_v21 = vpop.f32.mrb[65].mxu0  ;;  %v2524_v22 = vpop.f32.mrb[65].mxu1 }
 0x20c   : > { %v2013_v25 = vadd.f32 %v2012_v21, %v501_v13  ;;  %v2525_v26 = vadd.f32 %v2524_v22, %v629_v14  ;;  %v3527_v27 = vpop.f32.mrb[66].mxu0  ;;  %v3655_v28 = vpop.f32.mrb[66].mxu1  ;;  %v513_v21 = vld [vmem:[%s6207_s2 + $0x260] sm:$0xff] }
 0x20d   : > { %2845 = vst.msk [vmem:[%s6208_s3 + $0x210] sm:$0xff] %vm172_vm1, %v2021_v19  ;;  %2973 = vst.msk [vmem:[%s6208_s3 + $0x610] sm:$0xff] %vm172_vm1, %v2533_v20  ;;  %v2024_v29 = vadd.f32 %v3527_v27, %v504_v17  ;;  %v2536_v30 = vadd.f32 %v3655_v28, %v632_v18  ;;  %v2015_v31 = vpop.f32.mrb[67].mxu0  ;;  %v2527_v32 = vpop.f32.mrb[67].mxu1  ;;  %v515_v19 = vld [vmem:[%s6207_s2 + $0x270] sm:$0xff]  ;;  %v641_v22 = vld [vmem:[%s6207_s2 + $0x660] sm:$0xff] }
 0x20e   : > { %2843 = vst.msk [vmem:[%s6208_s3 + $0x200] sm:$0xff] %vm172_vm1, %v2013_v25  ;;  %2971 = vst.msk [vmem:[%s6208_s3 + $0x600] sm:$0xff] %vm172_vm1, %v2525_v26  ;;  %v2016_v33 = vadd.f32 %v2015_v31, %v502_v23  ;;  %v2528_v34 = vadd.f32 %v2527_v32, %v630_v24  ;;  %v643_v20 = vld [vmem:[%s6207_s2 + $0x670] sm:$0xff]  ;;  %v516_v25 = vld [vmem:[%s6207_s2 + $0x278] sm:$0xff] }
 0x20f   : > { %2846 = vst.msk [vmem:[%s6208_s3 + $0x218] sm:$0xff] %vm172_vm1, %v2024_v29  ;;  %2974 = vst.msk [vmem:[%s6208_s3 + $0x618] sm:$0xff] %vm172_vm1, %v2536_v30  ;;  %v644_v26 = vld [vmem:[%s6207_s2 + $0x678] sm:$0xff]  ;;  %v514_v31 = vld [vmem:[%s6207_s2 + $0x268] sm:$0xff] }
 0x210   : > { %2844 = vst.msk [vmem:[%s6208_s3 + $0x208] sm:$0xff] %vm172_vm1, %v2016_v33  ;;  %2972 = vst.msk [vmem:[%s6208_s3 + $0x608] sm:$0xff] %vm172_vm1, %v2528_v34  ;;  %v642_v32 = vld [vmem:[%s6207_s2 + $0x668] sm:$0xff] }
 0x212   : > { %v3530_v39 = vpop.f32.mrb[68].mxu0  ;;  %v3658_v40 = vpop.f32.mrb[68].mxu1 }
 0x213   : > { %v2037_v43 = vadd.f32 %v3530_v39, %v507_v35  ;;  %v2549_v44 = vadd.f32 %v3658_v40, %v635_v36  ;;  %v2028_v45 = vpop.f32.mrb[69].mxu0  ;;  %v2540_v46 = vpop.f32.mrb[69].mxu1 }
 0x214   : > { %v2029_v49 = vadd.f32 %v2028_v45, %v505_v37  ;;  %v2541_v50 = vadd.f32 %v2540_v46, %v633_v38  ;;  %v3531_v51 = vpop.f32.mrb[70].mxu0  ;;  %v3659_v52 = vpop.f32.mrb[70].mxu1  ;;  %v517_v45 = vld [vmem:[%s6207_s2 + $0x280] sm:$0xff] }
 0x215   : > { %2849 = vst.msk [vmem:[%s6208_s3 + $0x230] sm:$0xff] %vm172_vm1, %v2037_v43  ;;  %2977 = vst.msk [vmem:[%s6208_s3 + $0x630] sm:$0xff] %vm172_vm1, %v2549_v44  ;;  %v2040_v53 = vadd.f32 %v3531_v51, %v508_v41  ;;  %v2552_v54 = vadd.f32 %v3659_v52, %v636_v42  ;;  %v2031_v55 = vpop.f32.mrb[71].mxu0  ;;  %v2543_v56 = vpop.f32.mrb[71].mxu1  ;;  %v519_v43 = vld [vmem:[%s6207_s2 + $0x290] sm:$0xff]  ;;  %v645_v46 = vld [vmem:[%s6207_s2 + $0x680] sm:$0xff] }
 0x216   : > { %2847 = vst.msk [vmem:[%s6208_s3 + $0x220] sm:$0xff] %vm172_vm1, %v2029_v49  ;;  %2975 = vst.msk [vmem:[%s6208_s3 + $0x620] sm:$0xff] %vm172_vm1, %v2541_v50  ;;  %v2032_v57 = vadd.f32 %v2031_v55, %v506_v47  ;;  %v2544_v58 = vadd.f32 %v2543_v56, %v634_v48  ;;  %v647_v44 = vld [vmem:[%s6207_s2 + $0x690] sm:$0xff]  ;;  %v520_v49 = vld [vmem:[%s6207_s2 + $0x298] sm:$0xff] }
 0x217   : > { %2850 = vst.msk [vmem:[%s6208_s3 + $0x238] sm:$0xff] %vm172_vm1, %v2040_v53  ;;  %2978 = vst.msk [vmem:[%s6208_s3 + $0x638] sm:$0xff] %vm172_vm1, %v2552_v54  ;;  %v648_v50 = vld [vmem:[%s6207_s2 + $0x698] sm:$0xff]  ;;  %v518_v55 = vld [vmem:[%s6207_s2 + $0x288] sm:$0xff] }
 0x218   : > { %2848 = vst.msk [vmem:[%s6208_s3 + $0x228] sm:$0xff] %vm172_vm1, %v2032_v57  ;;  %2976 = vst.msk [vmem:[%s6208_s3 + $0x628] sm:$0xff] %vm172_vm1, %v2544_v58  ;;  %v646_v56 = vld [vmem:[%s6207_s2 + $0x688] sm:$0xff] }
 0x21a   : > { %v3534_v63 = vpop.f32.mrb[72].mxu0  ;;  %v3662_v0 = vpop.f32.mrb[72].mxu1 }
 0x21b   : > { %v2053_v3 = vadd.f32 %v3534_v63, %v511_v59  ;;  %v2565_v4 = vadd.f32 %v3662_v0, %v639_v60  ;;  %v2044_v5 = vpop.f32.mrb[73].mxu0  ;;  %v2556_v6 = vpop.f32.mrb[73].mxu1 }
 0x21c   : > { %v2045_v9 = vadd.f32 %v2044_v5, %v509_v61  ;;  %v2557_v10 = vadd.f32 %v2556_v6, %v637_v62  ;;  %v3535_v11 = vpop.f32.mrb[74].mxu0  ;;  %v3663_v12 = vpop.f32.mrb[74].mxu1  ;;  %v521_v5 = vld [vmem:[%s6207_s2 + $0x2a0] sm:$0xff] }
 0x21d   : > { %2853 = vst.msk [vmem:[%s6208_s3 + $0x250] sm:$0xff] %vm172_vm1, %v2053_v3  ;;  %2981 = vst.msk [vmem:[%s6208_s3 + $0x650] sm:$0xff] %vm172_vm1, %v2565_v4  ;;  %v2056_v13 = vadd.f32 %v3535_v11, %v512_v1  ;;  %v2568_v14 = vadd.f32 %v3663_v12, %v640_v2  ;;  %v2047_v15 = vpop.f32.mrb[75].mxu0  ;;  %v2559_v16 = vpop.f32.mrb[75].mxu1  ;;  %v523_v3 = vld [vmem:[%s6207_s2 + $0x2b0] sm:$0xff]  ;;  %v649_v6 = vld [vmem:[%s6207_s2 + $0x6a0] sm:$0xff] }
 0x21e   : > { %2851 = vst.msk [vmem:[%s6208_s3 + $0x240] sm:$0xff] %vm172_vm1, %v2045_v9  ;;  %2979 = vst.msk [vmem:[%s6208_s3 + $0x640] sm:$0xff] %vm172_vm1, %v2557_v10  ;;  %v2048_v17 = vadd.f32 %v2047_v15, %v510_v7  ;;  %v2560_v18 = vadd.f32 %v2559_v16, %v638_v8  ;;  %v651_v4 = vld [vmem:[%s6207_s2 + $0x6b0] sm:$0xff]  ;;  %v524_v9 = vld [vmem:[%s6207_s2 + $0x2b8] sm:$0xff] }
 0x21f   : > { %2854 = vst.msk [vmem:[%s6208_s3 + $0x258] sm:$0xff] %vm172_vm1, %v2056_v13  ;;  %2982 = vst.msk [vmem:[%s6208_s3 + $0x658] sm:$0xff] %vm172_vm1, %v2568_v14  ;;  %v652_v10 = vld [vmem:[%s6207_s2 + $0x6b8] sm:$0xff]  ;;  %v522_v15 = vld [vmem:[%s6207_s2 + $0x2a8] sm:$0xff] }
 0x220   : > { %2852 = vst.msk [vmem:[%s6208_s3 + $0x248] sm:$0xff] %vm172_vm1, %v2048_v17  ;;  %2980 = vst.msk [vmem:[%s6208_s3 + $0x648] sm:$0xff] %vm172_vm1, %v2560_v18  ;;  %v650_v16 = vld [vmem:[%s6207_s2 + $0x6a8] sm:$0xff] }
 0x222   : > { %v3538_v23 = vpop.f32.mrb[76].mxu0  ;;  %v3666_v24 = vpop.f32.mrb[76].mxu1 }
 0x223   : > { %v2069_v27 = vadd.f32 %v3538_v23, %v515_v19  ;;  %v2581_v28 = vadd.f32 %v3666_v24, %v643_v20  ;;  %v2060_v29 = vpop.f32.mrb[77].mxu0  ;;  %v2572_v30 = vpop.f32.mrb[77].mxu1 }
 0x224   : > { %v2061_v33 = vadd.f32 %v2060_v29, %v513_v21  ;;  %v2573_v34 = vadd.f32 %v2572_v30, %v641_v22  ;;  %v3539_v35 = vpop.f32.mrb[78].mxu0  ;;  %v3667_v36 = vpop.f32.mrb[78].mxu1  ;;  %v525_v29 = vld [vmem:[%s6207_s2 + $0x2c0] sm:$0xff] }
 0x225   : > { %2857 = vst.msk [vmem:[%s6208_s3 + $0x270] sm:$0xff] %vm172_vm1, %v2069_v27  ;;  %2985 = vst.msk [vmem:[%s6208_s3 + $0x670] sm:$0xff] %vm172_vm1, %v2581_v28  ;;  %v2072_v37 = vadd.f32 %v3539_v35, %v516_v25  ;;  %v2584_v38 = vadd.f32 %v3667_v36, %v644_v26  ;;  %v2063_v39 = vpop.f32.mrb[79].mxu0  ;;  %v2575_v40 = vpop.f32.mrb[79].mxu1  ;;  %v527_v27 = vld [vmem:[%s6207_s2 + $0x2d0] sm:$0xff]  ;;  %v653_v30 = vld [vmem:[%s6207_s2 + $0x6c0] sm:$0xff] }
 0x226   : > { %2855 = vst.msk [vmem:[%s6208_s3 + $0x260] sm:$0xff] %vm172_vm1, %v2061_v33  ;;  %2983 = vst.msk [vmem:[%s6208_s3 + $0x660] sm:$0xff] %vm172_vm1, %v2573_v34  ;;  %v2064_v41 = vadd.f32 %v2063_v39, %v514_v31  ;;  %v2576_v42 = vadd.f32 %v2575_v40, %v642_v32  ;;  %v655_v28 = vld [vmem:[%s6207_s2 + $0x6d0] sm:$0xff]  ;;  %v528_v33 = vld [vmem:[%s6207_s2 + $0x2d8] sm:$0xff] }
 0x227   : > { %2858 = vst.msk [vmem:[%s6208_s3 + $0x278] sm:$0xff] %vm172_vm1, %v2072_v37  ;;  %2986 = vst.msk [vmem:[%s6208_s3 + $0x678] sm:$0xff] %vm172_vm1, %v2584_v38  ;;  %v656_v34 = vld [vmem:[%s6207_s2 + $0x6d8] sm:$0xff]  ;;  %v526_v39 = vld [vmem:[%s6207_s2 + $0x2c8] sm:$0xff] }
 0x228   : > { %2856 = vst.msk [vmem:[%s6208_s3 + $0x268] sm:$0xff] %vm172_vm1, %v2064_v41  ;;  %2984 = vst.msk [vmem:[%s6208_s3 + $0x668] sm:$0xff] %vm172_vm1, %v2576_v42  ;;  %v654_v40 = vld [vmem:[%s6207_s2 + $0x6c8] sm:$0xff] }
 0x22a   : > { %v3542_v47 = vpop.f32.mrb[80].mxu0  ;;  %v3670_v48 = vpop.f32.mrb[80].mxu1 }
 0x22b   : > { %v2085_v51 = vadd.f32 %v3542_v47, %v519_v43  ;;  %v2597_v52 = vadd.f32 %v3670_v48, %v647_v44  ;;  %v2076_v53 = vpop.f32.mrb[81].mxu0  ;;  %v2588_v54 = vpop.f32.mrb[81].mxu1 }
 0x22c   : > { %v2077_v57 = vadd.f32 %v2076_v53, %v517_v45  ;;  %v2589_v58 = vadd.f32 %v2588_v54, %v645_v46  ;;  %v3543_v59 = vpop.f32.mrb[82].mxu0  ;;  %v3671_v60 = vpop.f32.mrb[82].mxu1  ;;  %v529_v53 = vld [vmem:[%s6207_s2 + $0x2e0] sm:$0xff] }
 0x22d   : > { %2861 = vst.msk [vmem:[%s6208_s3 + $0x290] sm:$0xff] %vm172_vm1, %v2085_v51  ;;  %2989 = vst.msk [vmem:[%s6208_s3 + $0x690] sm:$0xff] %vm172_vm1, %v2597_v52  ;;  %v2088_v61 = vadd.f32 %v3543_v59, %v520_v49  ;;  %v2600_v62 = vadd.f32 %v3671_v60, %v648_v50  ;;  %v2079_v63 = vpop.f32.mrb[83].mxu0  ;;  %v2591_v0 = vpop.f32.mrb[83].mxu1  ;;  %v531_v51 = vld [vmem:[%s6207_s2 + $0x2f0] sm:$0xff]  ;;  %v657_v54 = vld [vmem:[%s6207_s2 + $0x6e0] sm:$0xff] }
 0x22e   : > { %2859 = vst.msk [vmem:[%s6208_s3 + $0x280] sm:$0xff] %vm172_vm1, %v2077_v57  ;;  %2987 = vst.msk [vmem:[%s6208_s3 + $0x680] sm:$0xff] %vm172_vm1, %v2589_v58  ;;  %v2080_v1 = vadd.f32 %v2079_v63, %v518_v55  ;;  %v2592_v2 = vadd.f32 %v2591_v0, %v646_v56  ;;  %v659_v52 = vld [vmem:[%s6207_s2 + $0x6f0] sm:$0xff]  ;;  %v532_v57 = vld [vmem:[%s6207_s2 + $0x2f8] sm:$0xff] }
 0x22f   : > { %2862 = vst.msk [vmem:[%s6208_s3 + $0x298] sm:$0xff] %vm172_vm1, %v2088_v61  ;;  %2990 = vst.msk [vmem:[%s6208_s3 + $0x698] sm:$0xff] %vm172_vm1, %v2600_v62  ;;  %v660_v58 = vld [vmem:[%s6207_s2 + $0x6f8] sm:$0xff]  ;;  %v530_v63 = vld [vmem:[%s6207_s2 + $0x2e8] sm:$0xff] }
 0x230   : > { %2860 = vst.msk [vmem:[%s6208_s3 + $0x288] sm:$0xff] %vm172_vm1, %v2080_v1  ;;  %2988 = vst.msk [vmem:[%s6208_s3 + $0x688] sm:$0xff] %vm172_vm1, %v2592_v2  ;;  %v658_v0 = vld [vmem:[%s6207_s2 + $0x6e8] sm:$0xff] }
 0x232   : > { %v3546_v7 = vpop.f32.mrb[84].mxu0  ;;  %v3674_v8 = vpop.f32.mrb[84].mxu1 }
 0x233   : > { %v2101_v11 = vadd.f32 %v3546_v7, %v523_v3  ;;  %v2613_v12 = vadd.f32 %v3674_v8, %v651_v4  ;;  %v2092_v13 = vpop.f32.mrb[85].mxu0  ;;  %v2604_v14 = vpop.f32.mrb[85].mxu1 }
 0x234   : > { %v2093_v17 = vadd.f32 %v2092_v13, %v521_v5  ;;  %v2605_v18 = vadd.f32 %v2604_v14, %v649_v6  ;;  %v3547_v19 = vpop.f32.mrb[86].mxu0  ;;  %v3675_v20 = vpop.f32.mrb[86].mxu1  ;;  %v533_v13 = vld [vmem:[%s6207_s2 + $0x300] sm:$0xff] }
 0x235   : > { %2865 = vst.msk [vmem:[%s6208_s3 + $0x2b0] sm:$0xff] %vm172_vm1, %v2101_v11  ;;  %2993 = vst.msk [vmem:[%s6208_s3 + $0x6b0] sm:$0xff] %vm172_vm1, %v2613_v12  ;;  %v2104_v21 = vadd.f32 %v3547_v19, %v524_v9  ;;  %v2616_v22 = vadd.f32 %v3675_v20, %v652_v10  ;;  %v2095_v23 = vpop.f32.mrb[87].mxu0  ;;  %v2607_v24 = vpop.f32.mrb[87].mxu1  ;;  %v535_v11 = vld [vmem:[%s6207_s2 + $0x310] sm:$0xff]  ;;  %v661_v14 = vld [vmem:[%s6207_s2 + $0x700] sm:$0xff] }
 0x236   : > { %2863 = vst.msk [vmem:[%s6208_s3 + $0x2a0] sm:$0xff] %vm172_vm1, %v2093_v17  ;;  %2991 = vst.msk [vmem:[%s6208_s3 + $0x6a0] sm:$0xff] %vm172_vm1, %v2605_v18  ;;  %v2096_v25 = vadd.f32 %v2095_v23, %v522_v15  ;;  %v2608_v26 = vadd.f32 %v2607_v24, %v650_v16  ;;  %v663_v12 = vld [vmem:[%s6207_s2 + $0x710] sm:$0xff]  ;;  %v536_v17 = vld [vmem:[%s6207_s2 + $0x318] sm:$0xff] }
 0x237   : > { %2866 = vst.msk [vmem:[%s6208_s3 + $0x2b8] sm:$0xff] %vm172_vm1, %v2104_v21  ;;  %2994 = vst.msk [vmem:[%s6208_s3 + $0x6b8] sm:$0xff] %vm172_vm1, %v2616_v22  ;;  %v664_v18 = vld [vmem:[%s6207_s2 + $0x718] sm:$0xff]  ;;  %v534_v23 = vld [vmem:[%s6207_s2 + $0x308] sm:$0xff] }
 0x238   : > { %2864 = vst.msk [vmem:[%s6208_s3 + $0x2a8] sm:$0xff] %vm172_vm1, %v2096_v25  ;;  %2992 = vst.msk [vmem:[%s6208_s3 + $0x6a8] sm:$0xff] %vm172_vm1, %v2608_v26  ;;  %v662_v24 = vld [vmem:[%s6207_s2 + $0x708] sm:$0xff] }
 0x23a   : > { %v3550_v31 = vpop.f32.mrb[88].mxu0  ;;  %v3678_v32 = vpop.f32.mrb[88].mxu1 }
 0x23b   : > { %v2117_v35 = vadd.f32 %v3550_v31, %v527_v27  ;;  %v2629_v36 = vadd.f32 %v3678_v32, %v655_v28  ;;  %v2108_v37 = vpop.f32.mrb[89].mxu0  ;;  %v2620_v38 = vpop.f32.mrb[89].mxu1 }
 0x23c   : > { %v2109_v41 = vadd.f32 %v2108_v37, %v525_v29  ;;  %v2621_v42 = vadd.f32 %v2620_v38, %v653_v30  ;;  %v3551_v43 = vpop.f32.mrb[90].mxu0  ;;  %v3679_v44 = vpop.f32.mrb[90].mxu1  ;;  %v537_v37 = vld [vmem:[%s6207_s2 + $0x320] sm:$0xff] }
 0x23d   : > { %2869 = vst.msk [vmem:[%s6208_s3 + $0x2d0] sm:$0xff] %vm172_vm1, %v2117_v35  ;;  %2997 = vst.msk [vmem:[%s6208_s3 + $0x6d0] sm:$0xff] %vm172_vm1, %v2629_v36  ;;  %v2120_v45 = vadd.f32 %v3551_v43, %v528_v33  ;;  %v2632_v46 = vadd.f32 %v3679_v44, %v656_v34  ;;  %v2111_v47 = vpop.f32.mrb[91].mxu0  ;;  %v2623_v48 = vpop.f32.mrb[91].mxu1  ;;  %v539_v35 = vld [vmem:[%s6207_s2 + $0x330] sm:$0xff]  ;;  %v665_v38 = vld [vmem:[%s6207_s2 + $0x720] sm:$0xff] }
 0x23e   : > { %2867 = vst.msk [vmem:[%s6208_s3 + $0x2c0] sm:$0xff] %vm172_vm1, %v2109_v41  ;;  %2995 = vst.msk [vmem:[%s6208_s3 + $0x6c0] sm:$0xff] %vm172_vm1, %v2621_v42  ;;  %v2112_v49 = vadd.f32 %v2111_v47, %v526_v39  ;;  %v2624_v50 = vadd.f32 %v2623_v48, %v654_v40  ;;  %v667_v36 = vld [vmem:[%s6207_s2 + $0x730] sm:$0xff]  ;;  %v540_v41 = vld [vmem:[%s6207_s2 + $0x338] sm:$0xff] }
 0x23f   : > { %2870 = vst.msk [vmem:[%s6208_s3 + $0x2d8] sm:$0xff] %vm172_vm1, %v2120_v45  ;;  %2998 = vst.msk [vmem:[%s6208_s3 + $0x6d8] sm:$0xff] %vm172_vm1, %v2632_v46  ;;  %v668_v42 = vld [vmem:[%s6207_s2 + $0x738] sm:$0xff]  ;;  %v538_v47 = vld [vmem:[%s6207_s2 + $0x328] sm:$0xff] }
 0x240   : > { %2868 = vst.msk [vmem:[%s6208_s3 + $0x2c8] sm:$0xff] %vm172_vm1, %v2112_v49  ;;  %2996 = vst.msk [vmem:[%s6208_s3 + $0x6c8] sm:$0xff] %vm172_vm1, %v2624_v50  ;;  %v666_v48 = vld [vmem:[%s6207_s2 + $0x728] sm:$0xff] }
 0x242   : > { %v3554_v55 = vpop.f32.mrb[92].mxu0  ;;  %v3682_v56 = vpop.f32.mrb[92].mxu1 }
 0x243   : > { %v2133_v59 = vadd.f32 %v3554_v55, %v531_v51  ;;  %v2645_v60 = vadd.f32 %v3682_v56, %v659_v52  ;;  %v2124_v61 = vpop.f32.mrb[93].mxu0  ;;  %v2636_v62 = vpop.f32.mrb[93].mxu1 }
 0x244   : > { %v2125_v1 = vadd.f32 %v2124_v61, %v529_v53  ;;  %v2637_v2 = vadd.f32 %v2636_v62, %v657_v54  ;;  %v3555_v3 = vpop.f32.mrb[94].mxu0  ;;  %v3683_v4 = vpop.f32.mrb[94].mxu1  ;;  %v541_v61 = vld [vmem:[%s6207_s2 + $0x340] sm:$0xff] }
 0x245   : > { %2873 = vst.msk [vmem:[%s6208_s3 + $0x2f0] sm:$0xff] %vm172_vm1, %v2133_v59  ;;  %3001 = vst.msk [vmem:[%s6208_s3 + $0x6f0] sm:$0xff] %vm172_vm1, %v2645_v60  ;;  %v2136_v5 = vadd.f32 %v3555_v3, %v532_v57  ;;  %v2648_v6 = vadd.f32 %v3683_v4, %v660_v58  ;;  %v2127_v7 = vpop.f32.mrb[95].mxu0  ;;  %v2639_v8 = vpop.f32.mrb[95].mxu1  ;;  %v543_v59 = vld [vmem:[%s6207_s2 + $0x350] sm:$0xff]  ;;  %v669_v62 = vld [vmem:[%s6207_s2 + $0x740] sm:$0xff] }
 0x246   : > { %2871 = vst.msk [vmem:[%s6208_s3 + $0x2e0] sm:$0xff] %vm172_vm1, %v2125_v1  ;;  %2999 = vst.msk [vmem:[%s6208_s3 + $0x6e0] sm:$0xff] %vm172_vm1, %v2637_v2  ;;  %v2128_v9 = vadd.f32 %v2127_v7, %v530_v63  ;;  %v2640_v10 = vadd.f32 %v2639_v8, %v658_v0  ;;  %v671_v60 = vld [vmem:[%s6207_s2 + $0x750] sm:$0xff]  ;;  %v544_v1 = vld [vmem:[%s6207_s2 + $0x358] sm:$0xff] }
 0x247   : > { %2874 = vst.msk [vmem:[%s6208_s3 + $0x2f8] sm:$0xff] %vm172_vm1, %v2136_v5  ;;  %3002 = vst.msk [vmem:[%s6208_s3 + $0x6f8] sm:$0xff] %vm172_vm1, %v2648_v6  ;;  %v672_v2 = vld [vmem:[%s6207_s2 + $0x758] sm:$0xff]  ;;  %v542_v7 = vld [vmem:[%s6207_s2 + $0x348] sm:$0xff] }
 0x248   : > { %2872 = vst.msk [vmem:[%s6208_s3 + $0x2e8] sm:$0xff] %vm172_vm1, %v2128_v9  ;;  %3000 = vst.msk [vmem:[%s6208_s3 + $0x6e8] sm:$0xff] %vm172_vm1, %v2640_v10  ;;  %v670_v8 = vld [vmem:[%s6207_s2 + $0x748] sm:$0xff] }
 0x24a   : > { %v3558_v15 = vpop.f32.mrb[96].mxu0  ;;  %v3686_v16 = vpop.f32.mrb[96].mxu1 }
 0x24b   : > { %v2149_v19 = vadd.f32 %v3558_v15, %v535_v11  ;;  %v2661_v20 = vadd.f32 %v3686_v16, %v663_v12  ;;  %v2140_v21 = vpop.f32.mrb[97].mxu0  ;;  %v2652_v22 = vpop.f32.mrb[97].mxu1 }
 0x24c   : > { %v2141_v25 = vadd.f32 %v2140_v21, %v533_v13  ;;  %v2653_v26 = vadd.f32 %v2652_v22, %v661_v14  ;;  %v3559_v27 = vpop.f32.mrb[98].mxu0  ;;  %v3687_v28 = vpop.f32.mrb[98].mxu1  ;;  %v545_v21 = vld [vmem:[%s6207_s2 + $0x360] sm:$0xff] }
 0x24d   : > { %2877 = vst.msk [vmem:[%s6208_s3 + $0x310] sm:$0xff] %vm172_vm1, %v2149_v19  ;;  %3005 = vst.msk [vmem:[%s6208_s3 + $0x710] sm:$0xff] %vm172_vm1, %v2661_v20  ;;  %v2152_v29 = vadd.f32 %v3559_v27, %v536_v17  ;;  %v2664_v30 = vadd.f32 %v3687_v28, %v664_v18  ;;  %v2143_v31 = vpop.f32.mrb[99].mxu0  ;;  %v2655_v32 = vpop.f32.mrb[99].mxu1  ;;  %v547_v19 = vld [vmem:[%s6207_s2 + $0x370] sm:$0xff]  ;;  %v673_v22 = vld [vmem:[%s6207_s2 + $0x760] sm:$0xff] }
 0x24e   : > { %2875 = vst.msk [vmem:[%s6208_s3 + $0x300] sm:$0xff] %vm172_vm1, %v2141_v25  ;;  %3003 = vst.msk [vmem:[%s6208_s3 + $0x700] sm:$0xff] %vm172_vm1, %v2653_v26  ;;  %v2144_v33 = vadd.f32 %v2143_v31, %v534_v23  ;;  %v2656_v34 = vadd.f32 %v2655_v32, %v662_v24  ;;  %v675_v20 = vld [vmem:[%s6207_s2 + $0x770] sm:$0xff]  ;;  %v548_v25 = vld [vmem:[%s6207_s2 + $0x378] sm:$0xff] }
 0x24f   : > { %2878 = vst.msk [vmem:[%s6208_s3 + $0x318] sm:$0xff] %vm172_vm1, %v2152_v29  ;;  %3006 = vst.msk [vmem:[%s6208_s3 + $0x718] sm:$0xff] %vm172_vm1, %v2664_v30  ;;  %v676_v26 = vld [vmem:[%s6207_s2 + $0x778] sm:$0xff]  ;;  %v546_v31 = vld [vmem:[%s6207_s2 + $0x368] sm:$0xff] }
 0x250   : > { %2876 = vst.msk [vmem:[%s6208_s3 + $0x308] sm:$0xff] %vm172_vm1, %v2144_v33  ;;  %3004 = vst.msk [vmem:[%s6208_s3 + $0x708] sm:$0xff] %vm172_vm1, %v2656_v34  ;;  %v674_v32 = vld [vmem:[%s6207_s2 + $0x768] sm:$0xff] }
 0x252   : > { %v3562_v39 = vpop.f32.mrb[100].mxu0  ;;  %v3690_v40 = vpop.f32.mrb[100].mxu1 }
 0x253   : > { %v2165_v43 = vadd.f32 %v3562_v39, %v539_v35  ;;  %v2677_v44 = vadd.f32 %v3690_v40, %v667_v36  ;;  %v2156_v45 = vpop.f32.mrb[101].mxu0  ;;  %v2668_v46 = vpop.f32.mrb[101].mxu1 }
 0x254   : > { %v2157_v49 = vadd.f32 %v2156_v45, %v537_v37  ;;  %v2669_v50 = vadd.f32 %v2668_v46, %v665_v38  ;;  %v3563_v51 = vpop.f32.mrb[102].mxu0  ;;  %v3691_v52 = vpop.f32.mrb[102].mxu1  ;;  %v549_v45 = vld [vmem:[%s6207_s2 + $0x380] sm:$0xff] }
 0x255   : > { %2881 = vst.msk [vmem:[%s6208_s3 + $0x330] sm:$0xff] %vm172_vm1, %v2165_v43  ;;  %3009 = vst.msk [vmem:[%s6208_s3 + $0x730] sm:$0xff] %vm172_vm1, %v2677_v44  ;;  %v2168_v53 = vadd.f32 %v3563_v51, %v540_v41  ;;  %v2680_v54 = vadd.f32 %v3691_v52, %v668_v42  ;;  %v2159_v55 = vpop.f32.mrb[103].mxu0  ;;  %v2671_v56 = vpop.f32.mrb[103].mxu1  ;;  %v551_v43 = vld [vmem:[%s6207_s2 + $0x390] sm:$0xff]  ;;  %v677_v46 = vld [vmem:[%s6207_s2 + $0x780] sm:$0xff] }
 0x256   : > { %2879 = vst.msk [vmem:[%s6208_s3 + $0x320] sm:$0xff] %vm172_vm1, %v2157_v49  ;;  %3007 = vst.msk [vmem:[%s6208_s3 + $0x720] sm:$0xff] %vm172_vm1, %v2669_v50  ;;  %v2160_v57 = vadd.f32 %v2159_v55, %v538_v47  ;;  %v2672_v58 = vadd.f32 %v2671_v56, %v666_v48  ;;  %v679_v44 = vld [vmem:[%s6207_s2 + $0x790] sm:$0xff]  ;;  %v552_v49 = vld [vmem:[%s6207_s2 + $0x398] sm:$0xff] }
 0x257   : > { %2882 = vst.msk [vmem:[%s6208_s3 + $0x338] sm:$0xff] %vm172_vm1, %v2168_v53  ;;  %3010 = vst.msk [vmem:[%s6208_s3 + $0x738] sm:$0xff] %vm172_vm1, %v2680_v54  ;;  %v680_v50 = vld [vmem:[%s6207_s2 + $0x798] sm:$0xff]  ;;  %v550_v55 = vld [vmem:[%s6207_s2 + $0x388] sm:$0xff] }
 0x258   : > { %2880 = vst.msk [vmem:[%s6208_s3 + $0x328] sm:$0xff] %vm172_vm1, %v2160_v57  ;;  %3008 = vst.msk [vmem:[%s6208_s3 + $0x728] sm:$0xff] %vm172_vm1, %v2672_v58  ;;  %v678_v56 = vld [vmem:[%s6207_s2 + $0x788] sm:$0xff] }
 0x25a   : > { %v3566_v63 = vpop.f32.mrb[104].mxu0  ;;  %v3694_v0 = vpop.f32.mrb[104].mxu1 }
 0x25b   : > { %v2181_v3 = vadd.f32 %v3566_v63, %v543_v59  ;;  %v2693_v4 = vadd.f32 %v3694_v0, %v671_v60  ;;  %v2172_v5 = vpop.f32.mrb[105].mxu0  ;;  %v2684_v6 = vpop.f32.mrb[105].mxu1 }
 0x25c   : > { %v2173_v9 = vadd.f32 %v2172_v5, %v541_v61  ;;  %v2685_v10 = vadd.f32 %v2684_v6, %v669_v62  ;;  %v3567_v11 = vpop.f32.mrb[106].mxu0  ;;  %v3695_v12 = vpop.f32.mrb[106].mxu1  ;;  %v553_v5 = vld [vmem:[%s6207_s2 + $0x3a0] sm:$0xff] }
 0x25d   : > { %2885 = vst.msk [vmem:[%s6208_s3 + $0x350] sm:$0xff] %vm172_vm1, %v2181_v3  ;;  %3013 = vst.msk [vmem:[%s6208_s3 + $0x750] sm:$0xff] %vm172_vm1, %v2693_v4  ;;  %v2184_v13 = vadd.f32 %v3567_v11, %v544_v1  ;;  %v2696_v14 = vadd.f32 %v3695_v12, %v672_v2  ;;  %v2175_v15 = vpop.f32.mrb[107].mxu0  ;;  %v2687_v16 = vpop.f32.mrb[107].mxu1  ;;  %v555_v3 = vld [vmem:[%s6207_s2 + $0x3b0] sm:$0xff]  ;;  %v681_v6 = vld [vmem:[%s6207_s2 + $0x7a0] sm:$0xff] }
 0x25e   : > { %2883 = vst.msk [vmem:[%s6208_s3 + $0x340] sm:$0xff] %vm172_vm1, %v2173_v9  ;;  %3011 = vst.msk [vmem:[%s6208_s3 + $0x740] sm:$0xff] %vm172_vm1, %v2685_v10  ;;  %v2176_v17 = vadd.f32 %v2175_v15, %v542_v7  ;;  %v2688_v18 = vadd.f32 %v2687_v16, %v670_v8  ;;  %v683_v4 = vld [vmem:[%s6207_s2 + $0x7b0] sm:$0xff]  ;;  %v556_v9 = vld [vmem:[%s6207_s2 + $0x3b8] sm:$0xff] }
 0x25f   : > { %2886 = vst.msk [vmem:[%s6208_s3 + $0x358] sm:$0xff] %vm172_vm1, %v2184_v13  ;;  %3014 = vst.msk [vmem:[%s6208_s3 + $0x758] sm:$0xff] %vm172_vm1, %v2696_v14  ;;  %v684_v10 = vld [vmem:[%s6207_s2 + $0x7b8] sm:$0xff]  ;;  %v554_v15 = vld [vmem:[%s6207_s2 + $0x3a8] sm:$0xff] }
 0x260   : > { %2884 = vst.msk [vmem:[%s6208_s3 + $0x348] sm:$0xff] %vm172_vm1, %v2176_v17  ;;  %3012 = vst.msk [vmem:[%s6208_s3 + $0x748] sm:$0xff] %vm172_vm1, %v2688_v18  ;;  %v682_v16 = vld [vmem:[%s6207_s2 + $0x7a8] sm:$0xff] }
 0x262   : > { %v3570_v23 = vpop.f32.mrb[108].mxu0  ;;  %v3698_v24 = vpop.f32.mrb[108].mxu1 }
 0x263   : > { %v2197_v27 = vadd.f32 %v3570_v23, %v547_v19  ;;  %v2709_v28 = vadd.f32 %v3698_v24, %v675_v20  ;;  %v2188_v29 = vpop.f32.mrb[109].mxu0  ;;  %v2700_v30 = vpop.f32.mrb[109].mxu1 }
 0x264   : > { %v2189_v33 = vadd.f32 %v2188_v29, %v545_v21  ;;  %v2701_v34 = vadd.f32 %v2700_v30, %v673_v22  ;;  %v3571_v35 = vpop.f32.mrb[110].mxu0  ;;  %v3699_v36 = vpop.f32.mrb[110].mxu1  ;;  %v557_v29 = vld [vmem:[%s6207_s2 + $0x3c0] sm:$0xff] }
 0x265   : > { %2889 = vst.msk [vmem:[%s6208_s3 + $0x370] sm:$0xff] %vm172_vm1, %v2197_v27  ;;  %3017 = vst.msk [vmem:[%s6208_s3 + $0x770] sm:$0xff] %vm172_vm1, %v2709_v28  ;;  %v2200_v37 = vadd.f32 %v3571_v35, %v548_v25  ;;  %v2712_v38 = vadd.f32 %v3699_v36, %v676_v26  ;;  %v2191_v39 = vpop.f32.mrb[111].mxu0  ;;  %v2703_v40 = vpop.f32.mrb[111].mxu1  ;;  %v559_v27 = vld [vmem:[%s6207_s2 + $0x3d0] sm:$0xff]  ;;  %v685_v30 = vld [vmem:[%s6207_s2 + $0x7c0] sm:$0xff] }
 0x266   : > { %2887 = vst.msk [vmem:[%s6208_s3 + $0x360] sm:$0xff] %vm172_vm1, %v2189_v33  ;;  %3015 = vst.msk [vmem:[%s6208_s3 + $0x760] sm:$0xff] %vm172_vm1, %v2701_v34  ;;  %v2192_v41 = vadd.f32 %v2191_v39, %v546_v31  ;;  %v2704_v42 = vadd.f32 %v2703_v40, %v674_v32  ;;  %v687_v28 = vld [vmem:[%s6207_s2 + $0x7d0] sm:$0xff]  ;;  %v560_v33 = vld [vmem:[%s6207_s2 + $0x3d8] sm:$0xff] }
 0x267   : > { %2890 = vst.msk [vmem:[%s6208_s3 + $0x378] sm:$0xff] %vm172_vm1, %v2200_v37  ;;  %3018 = vst.msk [vmem:[%s6208_s3 + $0x778] sm:$0xff] %vm172_vm1, %v2712_v38  ;;  %v688_v34 = vld [vmem:[%s6207_s2 + $0x7d8] sm:$0xff]  ;;  %v558_v39 = vld [vmem:[%s6207_s2 + $0x3c8] sm:$0xff] }
 0x268   : > { %2888 = vst.msk [vmem:[%s6208_s3 + $0x368] sm:$0xff] %vm172_vm1, %v2192_v41  ;;  %3016 = vst.msk [vmem:[%s6208_s3 + $0x768] sm:$0xff] %vm172_vm1, %v2704_v42  ;;  %v686_v40 = vld [vmem:[%s6207_s2 + $0x7c8] sm:$0xff] }
 0x26a   : > { %v3574_v47 = vpop.f32.mrb[112].mxu0  ;;  %v3702_v48 = vpop.f32.mrb[112].mxu1 }
 0x26b   : > { %v2213_v51 = vadd.f32 %v3574_v47, %v551_v43  ;;  %v2725_v52 = vadd.f32 %v3702_v48, %v679_v44  ;;  %v2204_v53 = vpop.f32.mrb[113].mxu0  ;;  %v2716_v54 = vpop.f32.mrb[113].mxu1 }
 0x26c   : > { %v2205_v57 = vadd.f32 %v2204_v53, %v549_v45  ;;  %v2717_v58 = vadd.f32 %v2716_v54, %v677_v46  ;;  %v3575_v59 = vpop.f32.mrb[114].mxu0  ;;  %v3703_v60 = vpop.f32.mrb[114].mxu1  ;;  %v561_v53 = vld [vmem:[%s6207_s2 + $0x3e0] sm:$0xff] }
 0x26d   : > { %2893 = vst.msk [vmem:[%s6208_s3 + $0x390] sm:$0xff] %vm172_vm1, %v2213_v51  ;;  %3021 = vst.msk [vmem:[%s6208_s3 + $0x790] sm:$0xff] %vm172_vm1, %v2725_v52  ;;  %v2216_v61 = vadd.f32 %v3575_v59, %v552_v49  ;;  %v2728_v62 = vadd.f32 %v3703_v60, %v680_v50  ;;  %v2207_v63 = vpop.f32.mrb[115].mxu0  ;;  %v2719_v0 = vpop.f32.mrb[115].mxu1  ;;  %v563_v51 = vld [vmem:[%s6207_s2 + $0x3f0] sm:$0xff]  ;;  %v689_v54 = vld [vmem:[%s6207_s2 + $0x7e0] sm:$0xff] }
 0x26e   : > { %2891 = vst.msk [vmem:[%s6208_s3 + $0x380] sm:$0xff] %vm172_vm1, %v2205_v57  ;;  %3019 = vst.msk [vmem:[%s6208_s3 + $0x780] sm:$0xff] %vm172_vm1, %v2717_v58  ;;  %v2208_v1 = vadd.f32 %v2207_v63, %v550_v55  ;;  %v2720_v2 = vadd.f32 %v2719_v0, %v678_v56  ;;  %v691_v52 = vld [vmem:[%s6207_s2 + $0x7f0] sm:$0xff]  ;;  %v564_v57 = vld [vmem:[%s6207_s2 + $0x3f8] sm:$0xff] }
 0x26f   : > { %2894 = vst.msk [vmem:[%s6208_s3 + $0x398] sm:$0xff] %vm172_vm1, %v2216_v61  ;;  %3022 = vst.msk [vmem:[%s6208_s3 + $0x798] sm:$0xff] %vm172_vm1, %v2728_v62  ;;  %v692_v58 = vld [vmem:[%s6207_s2 + $0x7f8] sm:$0xff]  ;;  %v562_v63 = vld [vmem:[%s6207_s2 + $0x3e8] sm:$0xff] }
 0x270   : > { %2892 = vst.msk [vmem:[%s6208_s3 + $0x388] sm:$0xff] %vm172_vm1, %v2208_v1  ;;  %3020 = vst.msk [vmem:[%s6208_s3 + $0x788] sm:$0xff] %vm172_vm1, %v2720_v2  ;;  %v690_v0 = vld [vmem:[%s6207_s2 + $0x7e8] sm:$0xff] }
 0x272   : > { %v3578_v7 = vpop.f32.mrb[116].mxu0  ;;  %v3706_v8 = vpop.f32.mrb[116].mxu1 }
 0x273   : > { %v2229_v11 = vadd.f32 %v3578_v7, %v555_v3  ;;  %v2741_v12 = vadd.f32 %v3706_v8, %v683_v4  ;;  %v2220_v13 = vpop.f32.mrb[117].mxu0  ;;  %v2732_v14 = vpop.f32.mrb[117].mxu1 }
 0x274   : > { %v2221_v17 = vadd.f32 %v2220_v13, %v553_v5  ;;  %v2733_v18 = vadd.f32 %v2732_v14, %v681_v6  ;;  %v3579_v19 = vpop.f32.mrb[118].mxu0  ;;  %v3707_v20 = vpop.f32.mrb[118].mxu1 }
 0x275   : > { %2897 = vst.msk [vmem:[%s6208_s3 + $0x3b0] sm:$0xff] %vm172_vm1, %v2229_v11  ;;  %3025 = vst.msk [vmem:[%s6208_s3 + $0x7b0] sm:$0xff] %vm172_vm1, %v2741_v12  ;;  %v2232_v21 = vadd.f32 %v3579_v19, %v556_v9  ;;  %v2744_v22 = vadd.f32 %v3707_v20, %v684_v10  ;;  %v2223_v23 = vpop.f32.mrb[119].mxu0  ;;  %v2735_v24 = vpop.f32.mrb[119].mxu1 }
 0x276   : > { %2895 = vst.msk [vmem:[%s6208_s3 + $0x3a0] sm:$0xff] %vm172_vm1, %v2221_v17  ;;  %3023 = vst.msk [vmem:[%s6208_s3 + $0x7a0] sm:$0xff] %vm172_vm1, %v2733_v18  ;;  %v2224_v25 = vadd.f32 %v2223_v23, %v554_v15  ;;  %v2736_v26 = vadd.f32 %v2735_v24, %v682_v16 }
 0x277   : > { %2898 = vst.msk [vmem:[%s6208_s3 + $0x3b8] sm:$0xff] %vm172_vm1, %v2232_v21  ;;  %3026 = vst.msk [vmem:[%s6208_s3 + $0x7b8] sm:$0xff] %vm172_vm1, %v2744_v22 }
 0x278   : > { %2896 = vst.msk [vmem:[%s6208_s3 + $0x3a8] sm:$0xff] %vm172_vm1, %v2224_v25  ;;  %3024 = vst.msk [vmem:[%s6208_s3 + $0x7a8] sm:$0xff] %vm172_vm1, %v2736_v26 }
 0x27a   : > { %v3582_v31 = vpop.f32.mrb[120].mxu0  ;;  %v3710_v32 = vpop.f32.mrb[120].mxu1 }
 0x27b   : > { %v2245_v35 = vadd.f32 %v3582_v31, %v559_v27  ;;  %v2757_v36 = vadd.f32 %v3710_v32, %v687_v28  ;;  %v2236_v37 = vpop.f32.mrb[121].mxu0  ;;  %v2748_v38 = vpop.f32.mrb[121].mxu1 }
 0x27c   : > { %v2237_v41 = vadd.f32 %v2236_v37, %v557_v29  ;;  %v2749_v42 = vadd.f32 %v2748_v38, %v685_v30  ;;  %v3583_v43 = vpop.f32.mrb[122].mxu0  ;;  %v3711_v44 = vpop.f32.mrb[122].mxu1 }
 0x27d   : > { %2901 = vst.msk [vmem:[%s6208_s3 + $0x3d0] sm:$0xff] %vm172_vm1, %v2245_v35  ;;  %3029 = vst.msk [vmem:[%s6208_s3 + $0x7d0] sm:$0xff] %vm172_vm1, %v2757_v36  ;;  %v2248_v45 = vadd.f32 %v3583_v43, %v560_v33  ;;  %v2760_v46 = vadd.f32 %v3711_v44, %v688_v34  ;;  %v2239_v47 = vpop.f32.mrb[123].mxu0  ;;  %v2751_v48 = vpop.f32.mrb[123].mxu1 }
 0x27e   : > { %2899 = vst.msk [vmem:[%s6208_s3 + $0x3c0] sm:$0xff] %vm172_vm1, %v2237_v41  ;;  %3027 = vst.msk [vmem:[%s6208_s3 + $0x7c0] sm:$0xff] %vm172_vm1, %v2749_v42  ;;  %v2240_v49 = vadd.f32 %v2239_v47, %v558_v39  ;;  %v2752_v50 = vadd.f32 %v2751_v48, %v686_v40 }
 0x27f   : > { %2902 = vst.msk [vmem:[%s6208_s3 + $0x3d8] sm:$0xff] %vm172_vm1, %v2248_v45  ;;  %3030 = vst.msk [vmem:[%s6208_s3 + $0x7d8] sm:$0xff] %vm172_vm1, %v2760_v46 }
 0x280   : > { %2900 = vst.msk [vmem:[%s6208_s3 + $0x3c8] sm:$0xff] %vm172_vm1, %v2240_v49  ;;  %3028 = vst.msk [vmem:[%s6208_s3 + $0x7c8] sm:$0xff] %vm172_vm1, %v2752_v50 }
 0x282   : > { %v3586_v55 = vpop.f32.mrb[124].mxu0  ;;  %v3714_v56 = vpop.f32.mrb[124].mxu1 }
 0x283   : > { %v2261_v59 = vadd.f32 %v3586_v55, %v563_v51  ;;  %v2773_v60 = vadd.f32 %v3714_v56, %v691_v52  ;;  %v2252_v61 = vpop.f32.mrb[125].mxu0  ;;  %v2764_v62 = vpop.f32.mrb[125].mxu1 }
 0x284   : > { %v2253_v1 = vadd.f32 %v2252_v61, %v561_v53  ;;  %v2765_v2 = vadd.f32 %v2764_v62, %v689_v54  ;;  %v3587_v3 = vpop.f32.mrb[126].mxu0  ;;  %v3715_v4 = vpop.f32.mrb[126].mxu1 }
 0x285   : > { %2905 = vst.msk [vmem:[%s6208_s3 + $0x3f0] sm:$0xff] %vm172_vm1, %v2261_v59  ;;  %3033 = vst.msk [vmem:[%s6208_s3 + $0x7f0] sm:$0xff] %vm172_vm1, %v2773_v60  ;;  %v2264_v5 = vadd.f32 %v3587_v3, %v564_v57  ;;  %v2776_v6 = vadd.f32 %v3715_v4, %v692_v58  ;;  %v2255_v7 = vpop.f32.mrb[127].mxu0  ;;  %v2767_v8 = vpop.f32.mrb[127].mxu1 }
 0x286   : > { %2903 = vst.msk [vmem:[%s6208_s3 + $0x3e0] sm:$0xff] %vm172_vm1, %v2253_v1  ;;  %3031 = vst.msk [vmem:[%s6208_s3 + $0x7e0] sm:$0xff] %vm172_vm1, %v2765_v2  ;;  %v2256_v9 = vadd.f32 %v2255_v7, %v562_v63  ;;  %v2768_v10 = vadd.f32 %v2767_v8, %v690_v0 }
 0x287   : > { %2906 = vst.msk [vmem:[%s6208_s3 + $0x3f8] sm:$0xff] %vm172_vm1, %v2264_v5  ;;  %3034 = vst.msk [vmem:[%s6208_s3 + $0x7f8] sm:$0xff] %vm172_vm1, %v2776_v6 }
 0x288   : > { %2904 = vst.msk [vmem:[%s6208_s3 + $0x3e8] sm:$0xff] %vm172_vm1, %v2256_v9  ;;  %3032 = vst.msk [vmem:[%s6208_s3 + $0x7e8] sm:$0xff] %vm172_vm1, %v2768_v10 }
 0x289 PF: > { %s13_s12 = sadd.s32 1, %s3863_s12  }
 0x28a   : > { %p10_p6 = scmp.ge.s32.totalorder %s13_s12, 6  }
 0x28c   :  { %12 = sbr.rel (!%p10_p6) target bundleno = 1 (0x1), region = 66 }

</bundles_post_ra>
